<compile_context>
chip_gen: v7x
topology: tpu7x:2x2x1
jax: 0.10.0
libtpu: 0.0.40
codegen_flags: <defaults>
</compile_context>

<pallas_src>
import functools

import jax
import jax.numpy as jnp
import numpy as np
from jax.experimental import pallas as pl
from jax.experimental.pallas import tpu as pltpu


N_DISVOICE = 10      # len(disvoice_feature_names)
LANE = 128           # TPU lane width; logits are padded to this for dense stores
NEG_PAD = -1e9       # bias fill for padded logit lanes (exp() underflows to 0)


def _log_softmax(x):
    m = jnp.max(x, axis=-1, keepdims=True)
    s = x - m
    return s - jnp.log(jnp.sum(jnp.exp(s), axis=-1, keepdims=True))


# ---------------------------------------------------------------------------
# Fused kernel:
#   grid = (B // Bb, ceil(T / tT))
#   phase 1 (every step): accumulate sum_T of the streamed (Bb, tT, D) tile.
#   phase 2 (last T step): projector + all heads + PoE combine, one packed store.
# ---------------------------------------------------------------------------
def _fused_whisper_poe_kernel(
    # --- inputs ---
    x_ref,        # (Bb, tT, D)   encoder hidden states tile (bf16 by default)
    dis_ref,      # (Bb, 1, 10)   disvoice features
    proj_w, proj_b,               # (D, P), (1, P)
    aw1, ab1, aw2, ab2,           # audio_only_classifier (aw2/ab2 lane-padded)
    dpw, dpb,                     # disvoice_projector
    dw1, db1, dw2, db2,           # disvoice_only_classifier (dw2/db2 lane-padded)
    fw1_a, fw1_d, fb1,            # final_projector layer 1 (row-split audio/disvoice)
    fw2, fb2,                     # final_projector layer 2
    cw, cb,                       # classifier (lane-padded)
    # --- outputs ---
    out_ref,      # (Bb, 8, C_pad) packed logits:
                  #   row 0 combined, 1 multi_feature, 2 audio_only expert,
                  #   row 3 disvoice_only expert, 4 audio branch, 5-7 zeros
    # --- scratch ---
    acc_ref,      # (Bb, D) f32 running sum over T
    *, alpha, inv_t, t_total, t_tile):
    f32 = jnp.float32
    t = pl.program_id(1)

    @pl.when(t == 0)
    def _():
        acc_ref[...] = jnp.zeros_like(acc_ref)

    # Streaming T-reduction only (no matmul against the big tensor).
    x = x_ref[...].astype(f32)                                   # (Bb, tT, D)
    if t_total % t_tile != 0:
        # cdiv grid: mask the out-of-bounds rows of the last (partial) tile.
        valid = t_total - t * t_tile
        rows = jax.lax.broadcasted_iota(jnp.int32, x.shape, dimension=1)
        x = jnp.where(rows < valid, x, 0.0)
    acc_ref[...] += jnp.sum(x, axis=1)

    @pl.when(t == pl.num_programs(1) - 1)
    def _():
        def dense(v, w_ref, b_ref):
            # MXU matmul in the weight dtype (bf16 by default), f32 accumulate.
            return (jnp.dot(v.astype(w_ref.dtype), w_ref[...],
                            preferred_element_type=f32) + b_ref[...])

        relu = lambda v: jnp.maximum(v, 0.0)

        mean = acc_ref[...] * inv_t                              # (Bb, D) f32

        # projector applied to the T-mean (exact: affine commutes with mean)
        final_audio = dense(mean, proj_w, proj_b)                # (Bb, P)

        # audio_only branch classifier (grad_mul_const is identity in fwd)
        branch_audio = dense(relu(dense(final_audio, aw1, ab1)), aw2, ab2)

        # disvoice projector + disvoice_only classifier
        dis = dis_ref[:, 0, :].astype(f32)                       # (Bb, 10)
        dis_out = dense(dis, dpw, dpb)
        dis_logits = dense(relu(dense(dis_out, dw1, db1)), dw2, db2)

        # final_projector(concat([final_audio, dis_out])) without a lane concat:
        # concat(x, y) @ W1 == x @ W1[:P] + y @ W1[P:]
        h = (jnp.dot(final_audio.astype(fw1_a.dtype), fw1_a[...],
                     preferred_element_type=f32)
             + jnp.dot(dis_out.astype(fw1_d.dtype), fw1_d[...],
                       preferred_element_type=f32)
             + fb1[...])
        h = dense(relu(h), fw2, fb2)
        main_logits = dense(h, cw, cb)

        # Expert recomputation quirk of the reference: projector applied twice.
        #   projector(projector(X)).mean(T) == projector(projector(X).mean(T))
        exp_feat = dense(final_audio, proj_w, proj_b)
        exp_audio = dense(relu(dense(exp_feat, aw1, ab1)), aw2, ab2)

        # POE eval combination (self.training == False branch of the reference).
        # Padded logit lanes carry -1e9 bias -> exp underflows to 0 and never
        # perturbs the softmax over the real classes.
        combined = (_log_softmax(main_logits)
                    + alpha * _log_softmax(exp_audio)
                    + alpha * _log_softmax(dis_logits))

        zero_row = jnp.zeros_like(combined)
        out_ref[:, 0, :] = combined
        out_ref[:, 1, :] = main_logits
        out_ref[:, 2, :] = exp_audio
        out_ref[:, 3, :] = dis_logits
        out_ref[:, 4, :] = branch_audio
        out_ref[:, 5, :] = zero_row
        out_ref[:, 6, :] = zero_row
        out_ref[:, 7, :] = zero_row


# ---------------------------------------------------------------------------
# Tiling helpers
# ---------------------------------------------------------------------------
def _pick_batch_block(B, max_bb=8):
    """Largest divisor of B that is <= max_bb (avoids batch padding/masking)."""
    for bb in range(min(B, max_bb), 0, -1):
        if B % bb == 0:
            return bb
    return 1


def _pick_t_tile(T, D, Bb, itemsize, max_tile=512, x_budget_bytes=24 << 20):
    """T tile: whole T if small (legal: block dim == array dim), else a
    multiple-of-8 tile up to max_tile, shrunk to keep the double-buffered
    (Bb, tT, D) tiles inside the VMEM budget.  Partial last tiles are masked
    in-kernel, so tT does not need to divide T."""
    t = T if T <= max_tile else max_tile
    while t > 8 and Bb * t * D * itemsize * 2 > x_budget_bytes:
        t = max(8, ((t // 2) + 7) // 8 * 8)
    return t


# ---------------------------------------------------------------------------
# Parameter construction (deterministic, synthetic — no checkpoint load)
# ---------------------------------------------------------------------------
def init_params(key, d_model, proj, num_labels):
    assert d_model == proj, "reference double-applies projector; needs d_model == proj"
    ks = jax.random.split(key, 18)

    def W(k, i, o):
        return jax.random.normal(k, (i, o), jnp.float32) * 0.05

    def Bv(k, o):
        return jax.random.normal(k, (1, o), jnp.float32) * 0.01

    D = proj + N_DISVOICE  # final_output_dim
    return {
        # audio_model.projector : Linear(d_model, proj)
        "proj_w": W(ks[0], d_model, proj), "proj_b": Bv(ks[1], proj),
        # audio_only_classifier : Linear(proj, proj//2) -> ReLU -> Linear(proj//2, C)
        "audio_w1": W(ks[2], proj, proj // 2), "audio_b1": Bv(ks[3], proj // 2),
        "audio_w2": W(ks[4], proj // 2, num_labels), "audio_b2": Bv(ks[5], num_labels),
        # disvoice_projector : Linear(10, 10)
        "dis_proj_w": W(ks[6], N_DISVOICE, N_DISVOICE), "dis_proj_b": Bv(ks[7], N_DISVOICE),
        # disvoice_only_classifier : Linear(10, 5) -> ReLU -> Linear(5, C)
        "dis_w1": W(ks[8], N_DISVOICE, N_DISVOICE // 2), "dis_b1": Bv(ks[9], N_DISVOICE // 2),
        "dis_w2": W(ks[10], N_DISVOICE // 2, num_labels), "dis_b2": Bv(ks[11], num_labels),
        # final_projector : Linear(D, D//2) -> ReLU -> Linear(D//2, D//4)
        "fin_w1": W(ks[12], D, D // 2), "fin_b1": Bv(ks[13], D // 2),
        "fin_w2": W(ks[14], D // 2, D // 4), "fin_b2": Bv(ks[15], D // 4),
        # classifier : Linear(D//4, C)
        "cls_w": W(ks[16], D // 4, num_labels), "cls_b": Bv(ks[17], num_labels),
    }


# ---------------------------------------------------------------------------
# Forward pass (mirrors WhisperPoe.forward with encoder_outputs supplied,
# use_poe=True, use_disvoice=True, labels=None, task='cls')
# ---------------------------------------------------------------------------
def whisper_poe_forward(params, encoder_hidden_states, disvoice_features,
                        poe_alpha=0.5, t_tile=None, batch_block=None,
                        stream_dtype=jnp.bfloat16, compute_dtype=jnp.bfloat16,
                        single_buffer_weights=True, core_parallel_batch=False):
    p = params
    B, T, D = encoder_hidden_states.shape
    P = p["proj_w"].shape[1]
    C = p["cls_w"].shape[1]
    assert D == P, "reference double-applies projector; needs d_model == proj"

    f32 = jnp.float32
    C_pad = max(LANE, ((C + LANE - 1) // LANE) * LANE)

    # bf16 streaming of the dominant (B,T,D) tensor (accumulation stays f32).
    x = encoder_hidden_states
    if stream_dtype is not None and x.dtype != stream_dtype:
        x = x.astype(stream_dtype)

    Bb = batch_block if batch_block is not None else _pick_batch_block(B)
    assert B % Bb == 0, f"batch_block={Bb} must divide B={B}"

    itemx = jnp.dtype(x.dtype).itemsize
    if t_tile is None:
        t_tile = _pick_t_tile(T, D, Bb, itemx)
    n_t = pl.cdiv(T, t_tile)

    # disvoice as (B, 1, 10) so its block is (Bb, 1, 10) (full trailing dims).
    dis3 = disvoice_features.reshape(B, 1, N_DISVOICE).astype(f32)

    # Weight prep: bf16 matmul weights, f32 biases, lane-pad the logit layers.
    def as_w(w):
        return w.astype(compute_dtype)

    def pad_logit_layer(w, b):
        padc = C_pad - w.shape[1]
        return (jnp.pad(w, ((0, 0), (0, padc))),
                jnp.pad(b, ((0, 0), (0, padc)), constant_values=NEG_PAD))

    aw2, ab2 = pad_logit_layer(p["audio_w2"], p["audio_b2"])
    dw2, db2 = pad_logit_layer(p["dis_w2"], p["dis_b2"])
    cw, cb = pad_logit_layer(p["cls_w"], p["cls_b"])

    # Pre-split final_projector layer-1 weight -> no in-kernel lane concat.
    fw1_a = p["fin_w1"][:P]
    fw1_d = p["fin_w1"][P:]

    weights = (
        as_w(p["proj_w"]), p["proj_b"].astype(f32),
        as_w(p["audio_w1"]), p["audio_b1"].astype(f32), as_w(aw2), ab2.astype(f32),
        as_w(p["dis_proj_w"]), p["dis_proj_b"].astype(f32),
        as_w(p["dis_w1"]), p["dis_b1"].astype(f32), as_w(dw2), db2.astype(f32),
        as_w(fw1_a), as_w(fw1_d), p["fin_b1"].astype(f32),
        as_w(p["fin_w2"]), p["fin_b2"].astype(f32),
        as_w(cw), cb.astype(f32),
    )

    x_spec = pl.BlockSpec((Bb, t_tile, D), lambda b, t: (b, t, 0))
    dis_spec = pl.BlockSpec((Bb, 1, N_DISVOICE), lambda b, t: (b, 0, 0))
    out_spec = pl.BlockSpec((Bb, 8, C_pad), lambda b, t: (b, 0, 0))
    out_shape = jax.ShapeDtypeStruct((B, 8, C_pad), f32)

    kernel = functools.partial(_fused_whisper_poe_kernel,
                               alpha=float(poe_alpha), inv_t=1.0 / float(T),
                               t_total=T, t_tile=t_tile)

    # TODO(synk): on v7x, pltpu.CORE_PARALLEL on the batch axis shards the
    # streaming reduction across the two TensorCores; default off for safety.
    batch_sem = pltpu.CORE_PARALLEL if core_parallel_batch else pltpu.PARALLEL
    sems = (batch_sem, pltpu.ARBITRARY)

    # VMEM budget -> explicit limit (stay well under v7x's 64 MiB physical).
    w_bytes = sum(int(np.prod(w.shape)) * jnp.dtype(w.dtype).itemsize for w in weights)
    need = (Bb * t_tile * D * itemx * 2                 # double-buffered x tiles
            + w_bytes * (1 if single_buffer_weights else 2)
            + Bb * D * 4                                # acc scratch
            + Bb * 8 * C_pad * 4 * 2                    # packed output block
            + Bb * N_DISVOICE * 4 * 2)
    vmem_limit = int(min(max(2 * need, 32 << 20), 56 << 20))

    def launch(single_buffer):
        wmap = lambda b, t: (0, 0)
        if single_buffer:
            wspecs = [pl.BlockSpec(w.shape, wmap, pipeline_mode=pl.Buffered(1))
                      for w in weights]
        else:
            wspecs = [pl.BlockSpec(w.shape, wmap) for w in weights]
        return pl.pallas_call(
            kernel,
            out_shape=out_shape,
            grid=(B // Bb, n_t),
            in_specs=[x_spec, dis_spec] + wspecs,
            out_specs=out_spec,
            scratch_shapes=[pltpu.VMEM((Bb, D), f32)],
            compiler_params=pltpu.CompilerParams(
                dimension_semantics=sems,
                vmem_limit_bytes=vmem_limit),
        )(x, dis3, *weights)

    if single_buffer_weights:
        try:
            packed = launch(True)
        except Exception:
            # TODO(synk): pl.Buffered(1) rejected by this jax version; fall back
            # to default double-buffered weight blocks (costs VMEM only).
            packed = launch(False)
    else:
        packed = launch(False)

    comb = packed[:, 0, :C]
    main_logits = packed[:, 1, :C]
    exp_audio = packed[:, 2, :C]
    exp_dis = packed[:, 3, :C]
    branch_audio = packed[:, 4, :C]

    # labels is None -> loss is None; task != 'reg' -> no exp().
    # TODO(synk): CrossEntropyLoss / training POE-loss path not implemented (labels=None).
    return {
        "loss": None,
        "logits": comb,
        "individual_expert_logits": {
            "multi_feature": main_logits,
            "audio_only": exp_audio,
            "disvoice_only": exp_dis,
        },
        "hidden_states": None,
        "attentions": None,
        # equivalent to branch_logits[0] in the reference (training-only use)
        "_audio_only_branch_logits": branch_audio,
    }


# ---------------------------------------------------------------------------
# Pure-JAX reference (mirrors the PyTorch math) for a correctness check.
# ---------------------------------------------------------------------------
def _reference(params, x, dis, alpha):
    p = params

    def mlp2(z, w1, b1, w2, b2):
        return jnp.maximum(z @ w1 + b1, 0.0) @ w2 + b2

    hidden = x @ p["proj_w"] + p["proj_b"]                       # (B, T, P)
    final_audio = hidden.mean(axis=1)                            # (B, P)
    branch_audio = mlp2(final_audio, p["audio_w1"], p["audio_b1"],
                        p["audio_w2"], p["audio_b2"])
    dis_out = dis @ p["dis_proj_w"] + p["dis_proj_b"]
    dis_logits = mlp2(dis_out, p["dis_w1"], p["dis_b1"], p["dis_w2"], p["dis_b2"])
    fo = jnp.concatenate([final_audio, dis_out], axis=1)
    h = jnp.maximum(fo @ p["fin_w1"] + p["fin_b1"], 0.0)
    h = h @ p["fin_w2"] + p["fin_b2"]
    main = h @ p["cls_w"] + p["cls_b"]
    exp_feat = (hidden @ p["proj_w"] + p["proj_b"]).mean(axis=1)
    exp_audio = mlp2(exp_feat, p["audio_w1"], p["audio_b1"],
                     p["audio_w2"], p["audio_b2"])
    ls = lambda z: jax.nn.log_softmax(z, axis=-1)
    comb = ls(main) + alpha * ls(exp_audio) + alpha * ls(dis_logits)
    return comb, main, exp_audio, dis_logits, branch_audio


# ---------------------------------------------------------------------------
if __name__ == "__main__":
    B, T = 2, 16
    D_MODEL = 32            # whisper d_model (small synthetic)
    PROJ = 32               # classifier_proj_size (== d_model, see note above)
    NUM_LABELS = 2
    POE_ALPHA = 0.5

    root = jax.random.PRNGKey(0)
    k_param, k_hidden, k_dis = jax.random.split(root, 3)

    params = init_params(k_param, D_MODEL, PROJ, NUM_LABELS)

    # encoder_outputs[0] from the Whisper encoder, layout (B, T, D).
    encoder_hidden_states = jax.random.normal(k_hidden, (B, T, D_MODEL), jnp.float32)
    # disvoice features, layout (B, 10)
    disvoice_features = jax.random.normal(k_dis, (B, N_DISVOICE), jnp.float32)

    # ---- default (performance) path: bf16 streaming + bf16 MXU weights ----
    out = whisper_poe_forward(params, encoder_hidden_states, disvoice_features,
                              poe_alpha=POE_ALPHA)
    jax.block_until_ready(out["logits"])

    assert out["logits"].shape == (B, NUM_LABELS)
    assert out["individual_expert_logits"]["multi_feature"].shape == (B, NUM_LABELS)
    assert out["individual_expert_logits"]["audio_only"].shape == (B, NUM_LABELS)
    assert out["individual_expert_logits"]["disvoice_only"].shape == (B, NUM_LABELS)

    # ---- strict numerics path: f32 streaming + f32 weights vs reference ----
    out32 = whisper_poe_forward(params, encoder_hidden_states, disvoice_features,
                                poe_alpha=POE_ALPHA,
                                stream_dtype=jnp.float32,
                                compute_dtype=jnp.float32)
    jax.block_until_ready(out32["logits"])

    ref_comb, ref_main, ref_exp_a, ref_exp_d, ref_branch = _reference(
        params, encoder_hidden_states, disvoice_features, POE_ALPHA)

    np.testing.assert_allclose(out32["logits"], ref_comb, rtol=1e-3, atol=1e-3)
    np.testing.assert_allclose(out32["individual_expert_logits"]["multi_feature"],
                               ref_main, rtol=1e-3, atol=1e-3)
    np.testing.assert_allclose(out32["individual_expert_logits"]["audio_only"],
                               ref_exp_a, rtol=1e-3, atol=1e-3)
    np.testing.assert_allclose(out32["individual_expert_logits"]["disvoice_only"],
                               ref_exp_d, rtol=1e-3, atol=1e-3)
    np.testing.assert_allclose(out32["_audio_only_branch_logits"],
                               ref_branch, rtol=1e-3, atol=1e-3)

    # bf16 default path: loose agreement (bf16 quantization of stream + weights).
    np.testing.assert_allclose(out["logits"], ref_comb, rtol=5e-2, atol=5e-2)
    np.testing.assert_allclose(out["individual_expert_logits"]["multi_feature"],
                               ref_main, rtol=5e-2, atol=5e-2)
    np.testing.assert_allclose(out["individual_expert_logits"]["disvoice_only"],
                               ref_exp_d, rtol=5e-2, atol=5e-2)

    print("KERNEL_OK")
</pallas_src>

<mosaic_0001>
module attributes {stable_mosaic.version = 11 : i64} {
  func.func @_fused_whisper_poe_kernel(%arg0: i32, %arg1: i32, %arg2: memref<2x16x32xbf16, #tpu.memory_space<vmem>>, %arg3: memref<2x1x10xf32, #tpu.memory_space<vmem>>, %arg4: memref<32x32xbf16, #tpu.memory_space<vmem>>, %arg5: memref<1x32xf32, #tpu.memory_space<vmem>>, %arg6: memref<32x16xbf16, #tpu.memory_space<vmem>>, %arg7: memref<1x16xf32, #tpu.memory_space<vmem>>, %arg8: memref<16x128xbf16, #tpu.memory_space<vmem>>, %arg9: memref<1x128xf32, #tpu.memory_space<vmem>>, %arg10: memref<10x10xbf16, #tpu.memory_space<vmem>>, %arg11: memref<1x10xf32, #tpu.memory_space<vmem>>, %arg12: memref<10x5xbf16, #tpu.memory_space<vmem>>, %arg13: memref<1x5xf32, #tpu.memory_space<vmem>>, %arg14: memref<5x128xbf16, #tpu.memory_space<vmem>>, %arg15: memref<1x128xf32, #tpu.memory_space<vmem>>, %arg16: memref<32x21xbf16, #tpu.memory_space<vmem>>, %arg17: memref<10x21xbf16, #tpu.memory_space<vmem>>, %arg18: memref<1x21xf32, #tpu.memory_space<vmem>>, %arg19: memref<21x10xbf16, #tpu.memory_space<vmem>>, %arg20: memref<1x10xf32, #tpu.memory_space<vmem>>, %arg21: memref<10x128xbf16, #tpu.memory_space<vmem>>, %arg22: memref<1x128xf32, #tpu.memory_space<vmem>>, %arg23: memref<2x8x128xf32, #tpu.memory_space<vmem>>, %arg24: memref<2x32xf32, #tpu.memory_space<vmem>>) attributes {dimension_semantics = [#tpu.dimension_semantics<parallel>, #tpu.dimension_semantics<arbitrary>], iteration_bounds = array<i64: 1, 1>, scalar_prefetch = 0 : i64, scratch_operands = 1 : i64, tpu.core_type = #tpu.core_type<tc>, window_params = [{transform_indices = @transform_0, window_bounds = array<i64: 2, 16, 32>}, {transform_indices = @transform_1, window_bounds = array<i64: 2, 1, 10>}, {pipeline_mode = #tpu.pipeline_mode<synchronous>, transform_indices = @transform_2, window_bounds = array<i64: 32, 32>}, {pipeline_mode = #tpu.pipeline_mode<synchronous>, transform_indices = @transform_3, window_bounds = array<i64: 1, 32>}, {pipeline_mode = #tpu.pipeline_mode<synchronous>, transform_indices = @transform_4, window_bounds = array<i64: 32, 16>}, {pipeline_mode = #tpu.pipeline_mode<synchronous>, transform_indices = @transform_5, window_bounds = array<i64: 1, 16>}, {pipeline_mode = #tpu.pipeline_mode<synchronous>, transform_indices = @transform_6, window_bounds = array<i64: 16, 128>}, {pipeline_mode = #tpu.pipeline_mode<synchronous>, transform_indices = @transform_7, window_bounds = array<i64: 1, 128>}, {pipeline_mode = #tpu.pipeline_mode<synchronous>, transform_indices = @transform_8, window_bounds = array<i64: 10, 10>}, {pipeline_mode = #tpu.pipeline_mode<synchronous>, transform_indices = @transform_9, window_bounds = array<i64: 1, 10>}, {pipeline_mode = #tpu.pipeline_mode<synchronous>, transform_indices = @transform_10, window_bounds = array<i64: 10, 5>}, {pipeline_mode = #tpu.pipeline_mode<synchronous>, transform_indices = @transform_11, window_bounds = array<i64: 1, 5>}, {pipeline_mode = #tpu.pipeline_mode<synchronous>, transform_indices = @transform_12, window_bounds = array<i64: 5, 128>}, {pipeline_mode = #tpu.pipeline_mode<synchronous>, transform_indices = @transform_13, window_bounds = array<i64: 1, 128>}, {pipeline_mode = #tpu.pipeline_mode<synchronous>, transform_indices = @transform_14, window_bounds = array<i64: 32, 21>}, {pipeline_mode = #tpu.pipeline_mode<synchronous>, transform_indices = @transform_15, window_bounds = array<i64: 10, 21>}, {pipeline_mode = #tpu.pipeline_mode<synchronous>, transform_indices = @transform_16, window_bounds = array<i64: 1, 21>}, {pipeline_mode = #tpu.pipeline_mode<synchronous>, transform_indices = @transform_17, window_bounds = array<i64: 21, 10>}, {pipeline_mode = #tpu.pipeline_mode<synchronous>, transform_indices = @transform_18, window_bounds = array<i64: 1, 10>}, {pipeline_mode = #tpu.pipeline_mode<synchronous>, transform_indices = @transform_19, window_bounds = array<i64: 10, 128>}, {pipeline_mode = #tpu.pipeline_mode<synchronous>, transform_indices = @transform_20, window_bounds = array<i64: 1, 128>}, {transform_indices = @transform_21, window_bounds = array<i64: 2, 8, 128>}]} {
    %c0_i32 = arith.constant 0 : i32
    %0 = arith.cmpi eq, %arg1, %c0_i32 : i32
    %1 = arith.extui %0 : i1 to i32
    %c0_i32_0 = arith.constant 0 : i32
    %2 = arith.cmpi ne, %1, %c0_i32_0 : i32
    scf.if %2 {
      %cst_9 = arith.constant 0.000000e+00 : f32
      %12 = vector.broadcast %cst_9 : f32 to vector<2x32xf32>
      %c0_10 = arith.constant 0 : index
      %c0_11 = arith.constant 0 : index
      %13 = vector.load %arg24[%c0_10, %c0_11] : memref<2x32xf32, #tpu.memory_space<vmem>>, vector<2x32xf32>
      tpu.vector_store %arg24[%c0_10, %c0_11], %12 {strides = array<i32>} : memref<2x32xf32, #tpu.memory_space<vmem>>, vector<2x32xf32>,
    } else {
    }
    %c0 = arith.constant 0 : index
    %c0_1 = arith.constant 0 : index
    %c0_2 = arith.constant 0 : index
    %3 = vector.load %arg2[%c0, %c0_1, %c0_2] : memref<2x16x32xbf16, #tpu.memory_space<vmem>>, vector<2x16x32xbf16>
    %4 = arith.extf %3 : vector<2x16x32xbf16> to vector<2x16x32xf32>
    %c0_3 = arith.constant 0 : index
    %c0_4 = arith.constant 0 : index
    %5 = vector.load %arg24[%c0_3, %c0_4] : memref<2x32xf32, #tpu.memory_space<vmem>>, vector<2x32xf32>
    %cst = arith.constant dense<0.000000e+00> : vector<2x32xf32>
    %6 = vector.multi_reduction <add>, %4, %cst [1] : vector<2x16x32xf32> to vector<2x32xf32>
    %7 = arith.addf %5, %6 : vector<2x32xf32>
    %c0_5 = arith.constant 0 : index
    %c0_6 = arith.constant 0 : index
    %8 = vector.load %arg24[%c0_5, %c0_6] : memref<2x32xf32, #tpu.memory_space<vmem>>, vector<2x32xf32>
    tpu.vector_store %arg24[%c0_5, %c0_6], %7 {strides = array<i32>} : memref<2x32xf32, #tpu.memory_space<vmem>>, vector<2x32xf32>,
    %c0_i32_7 = arith.constant 0 : i32
    %9 = arith.cmpi eq, %arg1, %c0_i32_7 : i32
    %10 = arith.extui %9 : i1 to i32
    %c0_i32_8 = arith.constant 0 : i32
    %11 = arith.cmpi ne, %10, %c0_i32_8 : i32
    scf.if %11 {
      %c0_9 = arith.constant 0 : index
      %c0_10 = arith.constant 0 : index
      %12 = vector.load %arg24[%c0_9, %c0_10] : memref<2x32xf32, #tpu.memory_space<vmem>>, vector<2x32xf32>
      %cst_11 = arith.constant 6.250000e-02 : f32
      %13 = vector.broadcast %cst_11 : f32 to vector<2x32xf32>
      %14 = arith.mulf %12, %13 : vector<2x32xf32>
      %15 = arith.truncf %14 : vector<2x32xf32> to vector<2x32xbf16>
      %c0_12 = arith.constant 0 : index
      %c0_13 = arith.constant 0 : index
      %16 = vector.load %arg4[%c0_12, %c0_13] : memref<32x32xbf16, #tpu.memory_space<vmem>>, vector<32x32xbf16>
      %cst_14 = arith.constant dense<0.000000e+00> : vector<2x32xf32>
      %17 = tpu.matmul %15, %16, %cst_14 {dimension_numbers = #tpu.dot_dimension_numbers<[1], [0], [0], [1], [0, 0, 1, 1], [], []>} : vector<2x32xbf16>, vector<32x32xbf16>, vector<2x32xf32> -> vector<2x32xf32>
      %c0_15 = arith.constant 0 : index
      %c0_16 = arith.constant 0 : index
      %18 = vector.load %arg5[%c0_15, %c0_16] : memref<1x32xf32, #tpu.memory_space<vmem>>, vector<1x32xf32>
      %19 = vector.broadcast %18 : vector<1x32xf32> to vector<2x32xf32>
      %20 = arith.addf %17, %19 : vector<2x32xf32>
      %21 = arith.truncf %20 : vector<2x32xf32> to vector<2x32xbf16>
      %c0_17 = arith.constant 0 : index
      %c0_18 = arith.constant 0 : index
      %22 = vector.load %arg6[%c0_17, %c0_18] : memref<32x16xbf16, #tpu.memory_space<vmem>>, vector<32x16xbf16>
      %cst_19 = arith.constant dense<0.000000e+00> : vector<2x16xf32>
      %23 = tpu.matmul %21, %22, %cst_19 {dimension_numbers = #tpu.dot_dimension_numbers<[1], [0], [0], [1], [0, 0, 1, 1], [], []>} : vector<2x32xbf16>, vector<32x16xbf16>, vector<2x16xf32> -> vector<2x16xf32>
      %c0_20 = arith.constant 0 : index
      %c0_21 = arith.constant 0 : index
      %24 = vector.load %arg7[%c0_20, %c0_21] : memref<1x16xf32, #tpu.memory_space<vmem>>, vector<1x16xf32>
      %25 = vector.broadcast %24 : vector<1x16xf32> to vector<2x16xf32>
      %26 = arith.addf %23, %25 : vector<2x16xf32>
      %cst_22 = arith.constant 0.000000e+00 : f32
      %27 = vector.broadcast %cst_22 : f32 to vector<2x16xf32>
      %28 = arith.maximumf %26, %27 : vector<2x16xf32>
      %29 = arith.truncf %28 : vector<2x16xf32> to vector<2x16xbf16>
      %c0_23 = arith.constant 0 : index
      %c0_24 = arith.constant 0 : index
      %30 = vector.load %arg8[%c0_23, %c0_24] : memref<16x128xbf16, #tpu.memory_space<vmem>>, vector<16x128xbf16>
      %cst_25 = arith.constant dense<0.000000e+00> : vector<2x128xf32>
      %31 = tpu.matmul %29, %30, %cst_25 {dimension_numbers = #tpu.dot_dimension_numbers<[1], [0], [0], [1], [0, 0, 1, 1], [], []>} : vector<2x16xbf16>, vector<16x128xbf16>, vector<2x128xf32> -> vector<2x128xf32>
      %c0_26 = arith.constant 0 : index
      %c0_27 = arith.constant 0 : index
      %32 = vector.load %arg9[%c0_26, %c0_27] : memref<1x128xf32, #tpu.memory_space<vmem>>, vector<1x128xf32>
      %33 = vector.broadcast %32 : vector<1x128xf32> to vector<2x128xf32>
      %34 = arith.addf %31, %33 : vector<2x128xf32>
      %c0_28 = arith.constant 0 : index
      %c0_29 = arith.constant 0 : index
      %c0_30 = arith.constant 0 : index
      %35 = vector.load %arg3[%c0_28, %c0_29, %c0_30] : memref<2x1x10xf32, #tpu.memory_space<vmem>>, vector<2x1x10xf32>
      %36 = vector.shape_cast %35 : vector<2x1x10xf32> to vector<2x10xf32>
      %37 = arith.truncf %36 : vector<2x10xf32> to vector<2x10xbf16>
      %c0_31 = arith.constant 0 : index
      %c0_32 = arith.constant 0 : index
      %38 = vector.load %arg10[%c0_31, %c0_32] : memref<10x10xbf16, #tpu.memory_space<vmem>>, vector<10x10xbf16>
      %cst_33 = arith.constant dense<0.000000e+00> : vector<2x10xf32>
      %39 = tpu.matmul %37, %38, %cst_33 {dimension_numbers = #tpu.dot_dimension_numbers<[1], [0], [0], [1], [0, 0, 1, 1], [], []>} : vector<2x10xbf16>, vector<10x10xbf16>, vector<2x10xf32> -> vector<2x10xf32>
      %c0_34 = arith.constant 0 : index
      %c0_35 = arith.constant 0 : index
      %40 = vector.load %arg11[%c0_34, %c0_35] : memref<1x10xf32, #tpu.memory_space<vmem>>, vector<1x10xf32>
      %41 = vector.broadcast %40 : vector<1x10xf32> to vector<2x10xf32>
      %42 = arith.addf %39, %41 : vector<2x10xf32>
      %43 = arith.truncf %42 : vector<2x10xf32> to vector<2x10xbf16>
      %c0_36 = arith.constant 0 : index
      %c0_37 = arith.constant 0 : index
      %44 = vector.load %arg12[%c0_36, %c0_37] : memref<10x5xbf16, #tpu.memory_space<vmem>>, vector<10x5xbf16>
      %cst_38 = arith.constant dense<0.000000e+00> : vector<2x5xf32>
      %45 = tpu.matmul %43, %44, %cst_38 {dimension_numbers = #tpu.dot_dimension_numbers<[1], [0], [0], [1], [0, 0, 1, 1], [], []>} : vector<2x10xbf16>, vector<10x5xbf16>, vector<2x5xf32> -> vector<2x5xf32>
      %c0_39 = arith.constant 0 : index
      %c0_40 = arith.constant 0 : index
      %46 = vector.load %arg13[%c0_39, %c0_40] : memref<1x5xf32, #tpu.memory_space<vmem>>, vector<1x5xf32>
      %47 = vector.broadcast %46 : vector<1x5xf32> to vector<2x5xf32>
      %48 = arith.addf %45, %47 : vector<2x5xf32>
      %cst_41 = arith.constant 0.000000e+00 : f32
      %49 = vector.broadcast %cst_41 : f32 to vector<2x5xf32>
      %50 = arith.maximumf %48, %49 : vector<2x5xf32>
      %51 = arith.truncf %50 : vector<2x5xf32> to vector<2x5xbf16>
      %c0_42 = arith.constant 0 : index
      %c0_43 = arith.constant 0 : index
      %52 = vector.load %arg14[%c0_42, %c0_43] : memref<5x128xbf16, #tpu.memory_space<vmem>>, vector<5x128xbf16>
      %cst_44 = arith.constant dense<0.000000e+00> : vector<2x128xf32>
      %53 = tpu.matmul %51, %52, %cst_44 {dimension_numbers = #tpu.dot_dimension_numbers<[1], [0], [0], [1], [0, 0, 1, 1], [], []>} : vector<2x5xbf16>, vector<5x128xbf16>, vector<2x128xf32> -> vector<2x128xf32>
      %c0_45 = arith.constant 0 : index
      %c0_46 = arith.constant 0 : index
      %54 = vector.load %arg15[%c0_45, %c0_46] : memref<1x128xf32, #tpu.memory_space<vmem>>, vector<1x128xf32>
      %55 = vector.broadcast %54 : vector<1x128xf32> to vector<2x128xf32>
      %56 = arith.addf %53, %55 : vector<2x128xf32>
      %57 = arith.truncf %20 : vector<2x32xf32> to vector<2x32xbf16>
      %c0_47 = arith.constant 0 : index
      %c0_48 = arith.constant 0 : index
      %58 = vector.load %arg16[%c0_47, %c0_48] : memref<32x21xbf16, #tpu.memory_space<vmem>>, vector<32x21xbf16>
      %cst_49 = arith.constant dense<0.000000e+00> : vector<2x21xf32>
      %59 = tpu.matmul %57, %58, %cst_49 {dimension_numbers = #tpu.dot_dimension_numbers<[1], [0], [0], [1], [0, 0, 1, 1], [], []>} : vector<2x32xbf16>, vector<32x21xbf16>, vector<2x21xf32> -> vector<2x21xf32>
      %60 = arith.truncf %42 : vector<2x10xf32> to vector<2x10xbf16>
      %c0_50 = arith.constant 0 : index
      %c0_51 = arith.constant 0 : index
      %61 = vector.load %arg17[%c0_50, %c0_51] : memref<10x21xbf16, #tpu.memory_space<vmem>>, vector<10x21xbf16>
      %cst_52 = arith.constant dense<0.000000e+00> : vector<2x21xf32>
      %62 = tpu.matmul %60, %61, %cst_52 {dimension_numbers = #tpu.dot_dimension_numbers<[1], [0], [0], [1], [0, 0, 1, 1], [], []>} : vector<2x10xbf16>, vector<10x21xbf16>, vector<2x21xf32> -> vector<2x21xf32>
      %63 = arith.addf %59, %62 : vector<2x21xf32>
      %c0_53 = arith.constant 0 : index
      %c0_54 = arith.constant 0 : index
      %64 = vector.load %arg18[%c0_53, %c0_54] : memref<1x21xf32, #tpu.memory_space<vmem>>, vector<1x21xf32>
      %65 = vector.broadcast %64 : vector<1x21xf32> to vector<2x21xf32>
      %66 = arith.addf %63, %65 : vector<2x21xf32>
      %cst_55 = arith.constant 0.000000e+00 : f32
      %67 = vector.broadcast %cst_55 : f32 to vector<2x21xf32>
      %68 = arith.maximumf %66, %67 : vector<2x21xf32>
      %69 = arith.truncf %68 : vector<2x21xf32> to vector<2x21xbf16>
      %c0_56 = arith.constant 0 : index
      %c0_57 = arith.constant 0 : index
      %70 = vector.load %arg19[%c0_56, %c0_57] : memref<21x10xbf16, #tpu.memory_space<vmem>>, vector<21x10xbf16>
      %cst_58 = arith.constant dense<0.000000e+00> : vector<2x10xf32>
      %71 = tpu.matmul %69, %70, %cst_58 {dimension_numbers = #tpu.dot_dimension_numbers<[1], [0], [0], [1], [0, 0, 1, 1], [], []>} : vector<2x21xbf16>, vector<21x10xbf16>, vector<2x10xf32> -> vector<2x10xf32>
      %c0_59 = arith.constant 0 : index
      %c0_60 = arith.constant 0 : index
      %72 = vector.load %arg20[%c0_59, %c0_60] : memref<1x10xf32, #tpu.memory_space<vmem>>, vector<1x10xf32>
      %73 = vector.broadcast %72 : vector<1x10xf32> to vector<2x10xf32>
      %74 = arith.addf %71, %73 : vector<2x10xf32>
      %75 = arith.truncf %74 : vector<2x10xf32> to vector<2x10xbf16>
      %c0_61 = arith.constant 0 : index
      %c0_62 = arith.constant 0 : index
      %76 = vector.load %arg21[%c0_61, %c0_62] : memref<10x128xbf16, #tpu.memory_space<vmem>>, vector<10x128xbf16>
      %cst_63 = arith.constant dense<0.000000e+00> : vector<2x128xf32>
      %77 = tpu.matmul %75, %76, %cst_63 {dimension_numbers = #tpu.dot_dimension_numbers<[1], [0], [0], [1], [0, 0, 1, 1], [], []>} : vector<2x10xbf16>, vector<10x128xbf16>, vector<2x128xf32> -> vector<2x128xf32>
      %c0_64 = arith.constant 0 : index
      %c0_65 = arith.constant 0 : index
      %78 = vector.load %arg22[%c0_64, %c0_65] : memref<1x128xf32, #tpu.memory_space<vmem>>, vector<1x128xf32>
      %79 = vector.broadcast %78 : vector<1x128xf32> to vector<2x128xf32>
      %80 = arith.addf %77, %79 : vector<2x128xf32>
      %81 = arith.truncf %20 : vector<2x32xf32> to vector<2x32xbf16>
      %c0_66 = arith.constant 0 : index
      %c0_67 = arith.constant 0 : index
      %82 = vector.load %arg4[%c0_66, %c0_67] : memref<32x32xbf16, #tpu.memory_space<vmem>>, vector<32x32xbf16>
      %cst_68 = arith.constant dense<0.000000e+00> : vector<2x32xf32>
      %83 = tpu.matmul %81, %82, %cst_68 {dimension_numbers = #tpu.dot_dimension_numbers<[1], [0], [0], [1], [0, 0, 1, 1], [], []>} : vector<2x32xbf16>, vector<32x32xbf16>, vector<2x32xf32> -> vector<2x32xf32>
      %c0_69 = arith.constant 0 : index
      %c0_70 = arith.constant 0 : index
      %84 = vector.load %arg5[%c0_69, %c0_70] : memref<1x32xf32, #tpu.memory_space<vmem>>, vector<1x32xf32>
      %85 = vector.broadcast %84 : vector<1x32xf32> to vector<2x32xf32>
      %86 = arith.addf %83, %85 : vector<2x32xf32>
      %87 = arith.truncf %86 : vector<2x32xf32> to vector<2x32xbf16>
      %c0_71 = arith.constant 0 : index
      %c0_72 = arith.constant 0 : index
      %88 = vector.load %arg6[%c0_71, %c0_72] : memref<32x16xbf16, #tpu.memory_space<vmem>>, vector<32x16xbf16>
      %cst_73 = arith.constant dense<0.000000e+00> : vector<2x16xf32>
      %89 = tpu.matmul %87, %88, %cst_73 {dimension_numbers = #tpu.dot_dimension_numbers<[1], [0], [0], [1], [0, 0, 1, 1], [], []>} : vector<2x32xbf16>, vector<32x16xbf16>, vector<2x16xf32> -> vector<2x16xf32>
      %c0_74 = arith.constant 0 : index
      %c0_75 = arith.constant 0 : index
      %90 = vector.load %arg7[%c0_74, %c0_75] : memref<1x16xf32, #tpu.memory_space<vmem>>, vector<1x16xf32>
      %91 = vector.broadcast %90 : vector<1x16xf32> to vector<2x16xf32>
      %92 = arith.addf %89, %91 : vector<2x16xf32>
      %cst_76 = arith.constant 0.000000e+00 : f32
      %93 = vector.broadcast %cst_76 : f32 to vector<2x16xf32>
      %94 = arith.maximumf %92, %93 : vector<2x16xf32>
      %95 = arith.truncf %94 : vector<2x16xf32> to vector<2x16xbf16>
      %c0_77 = arith.constant 0 : index
      %c0_78 = arith.constant 0 : index
      %96 = vector.load %arg8[%c0_77, %c0_78] : memref<16x128xbf16, #tpu.memory_space<vmem>>, vector<16x128xbf16>
      %cst_79 = arith.constant dense<0.000000e+00> : vector<2x128xf32>
      %97 = tpu.matmul %95, %96, %cst_79 {dimension_numbers = #tpu.dot_dimension_numbers<[1], [0], [0], [1], [0, 0, 1, 1], [], []>} : vector<2x16xbf16>, vector<16x128xbf16>, vector<2x128xf32> -> vector<2x128xf32>
      %c0_80 = arith.constant 0 : index
      %c0_81 = arith.constant 0 : index
      %98 = vector.load %arg9[%c0_80, %c0_81] : memref<1x128xf32, #tpu.memory_space<vmem>>, vector<1x128xf32>
      %99 = vector.broadcast %98 : vector<1x128xf32> to vector<2x128xf32>
      %100 = arith.addf %97, %99 : vector<2x128xf32>
      %cst_82 = arith.constant dense<0xFF800000> : vector<2xf32>
      %101 = vector.multi_reduction <maximumf>, %80, %cst_82 [1] : vector<2x128xf32> to vector<2xf32>
      %102 = vector.shape_cast %101 : vector<2xf32> to vector<2x1xf32>
      %103 = vector.broadcast %102 : vector<2x1xf32> to vector<2x128xf32>
      %104 = arith.subf %80, %103 : vector<2x128xf32>
      %105 = math.exp %104 : vector<2x128xf32>
      %cst_83 = arith.constant dense<0.000000e+00> : vector<2xf32>
      %106 = vector.multi_reduction <add>, %105, %cst_83 [1] : vector<2x128xf32> to vector<2xf32>
      %107 = vector.shape_cast %106 : vector<2xf32> to vector<2x1xf32>
      %108 = math.log %107 : vector<2x1xf32>
      %109 = vector.broadcast %108 : vector<2x1xf32> to vector<2x128xf32>
      %110 = arith.subf %104, %109 : vector<2x128xf32>
      %cst_84 = arith.constant dense<0xFF800000> : vector<2xf32>
      %111 = vector.multi_reduction <maximumf>, %100, %cst_84 [1] : vector<2x128xf32> to vector<2xf32>
      %112 = vector.shape_cast %111 : vector<2xf32> to vector<2x1xf32>
      %113 = vector.broadcast %112 : vector<2x1xf32> to vector<2x128xf32>
      %114 = arith.subf %100, %113 : vector<2x128xf32>
      %115 = math.exp %114 : vector<2x128xf32>
      %cst_85 = arith.constant dense<0.000000e+00> : vector<2xf32>
      %116 = vector.multi_reduction <add>, %115, %cst_85 [1] : vector<2x128xf32> to vector<2xf32>
      %117 = vector.shape_cast %116 : vector<2xf32> to vector<2x1xf32>
      %118 = math.log %117 : vector<2x1xf32>
      %119 = vector.broadcast %118 : vector<2x1xf32> to vector<2x128xf32>
      %120 = arith.subf %114, %119 : vector<2x128xf32>
      %cst_86 = arith.constant 5.000000e-01 : f32
      %121 = vector.broadcast %cst_86 : f32 to vector<2x128xf32>
      %122 = arith.mulf %121, %120 : vector<2x128xf32>
      %123 = arith.addf %110, %122 : vector<2x128xf32>
      %cst_87 = arith.constant dense<0xFF800000> : vector<2xf32>
      %124 = vector.multi_reduction <maximumf>, %56, %cst_87 [1] : vector<2x128xf32> to vector<2xf32>
      %125 = vector.shape_cast %124 : vector<2xf32> to vector<2x1xf32>
      %126 = vector.broadcast %125 : vector<2x1xf32> to vector<2x128xf32>
      %127 = arith.subf %56, %126 : vector<2x128xf32>
      %128 = math.exp %127 : vector<2x128xf32>
      %cst_88 = arith.constant dense<0.000000e+00> : vector<2xf32>
      %129 = vector.multi_reduction <add>, %128, %cst_88 [1] : vector<2x128xf32> to vector<2xf32>
      %130 = vector.shape_cast %129 : vector<2xf32> to vector<2x1xf32>
      %131 = math.log %130 : vector<2x1xf32>
      %132 = vector.broadcast %131 : vector<2x1xf32> to vector<2x128xf32>
      %133 = arith.subf %127, %132 : vector<2x128xf32>
      %cst_89 = arith.constant 5.000000e-01 : f32
      %134 = vector.broadcast %cst_89 : f32 to vector<2x128xf32>
      %135 = arith.mulf %134, %133 : vector<2x128xf32>
      %136 = arith.addf %123, %135 : vector<2x128xf32>
      %cst_90 = arith.constant 0.000000e+00 : f32
      %137 = vector.broadcast %cst_90 : f32 to vector<2x128xf32>
      %c0_91 = arith.constant 0 : index
      %c0_92 = arith.constant 0 : index
      %c0_93 = arith.constant 0 : index
      %138 = vector.load %arg23[%c0_91, %c0_92, %c0_93] : memref<2x8x128xf32, #tpu.memory_space<vmem>>, vector<2x1x128xf32>
      %139 = vector.shape_cast %138 : vector<2x1x128xf32> to vector<2x128xf32>
      %140 = vector.shape_cast %136 : vector<2x128xf32> to vector<2x1x128xf32>
      tpu.vector_store %arg23[%c0_91, %c0_92, %c0_93], %140 {strides = array<i32>} : memref<2x8x128xf32, #tpu.memory_space<vmem>>, vector<2x1x128xf32>,
      %c0_94 = arith.constant 0 : index
      %c1 = arith.constant 1 : index
      %c0_95 = arith.constant 0 : index
      %141 = vector.load %arg23[%c0_94, %c1, %c0_95] : memref<2x8x128xf32, #tpu.memory_space<vmem>>, vector<2x1x128xf32>
      %142 = vector.shape_cast %141 : vector<2x1x128xf32> to vector<2x128xf32>
      %143 = vector.shape_cast %80 : vector<2x128xf32> to vector<2x1x128xf32>
      tpu.vector_store %arg23[%c0_94, %c1, %c0_95], %143 {strides = array<i32>} : memref<2x8x128xf32, #tpu.memory_space<vmem>>, vector<2x1x128xf32>,
      %c0_96 = arith.constant 0 : index
      %c2 = arith.constant 2 : index
      %c0_97 = arith.constant 0 : index
      %144 = vector.load %arg23[%c0_96, %c2, %c0_97] : memref<2x8x128xf32, #tpu.memory_space<vmem>>, vector<2x1x128xf32>
      %145 = vector.shape_cast %144 : vector<2x1x128xf32> to vector<2x128xf32>
      %146 = vector.shape_cast %100 : vector<2x128xf32> to vector<2x1x128xf32>
      tpu.vector_store %arg23[%c0_96, %c2, %c0_97], %146 {strides = array<i32>} : memref<2x8x128xf32, #tpu.memory_space<vmem>>, vector<2x1x128xf32>,
      %c0_98 = arith.constant 0 : index
      %c3 = arith.constant 3 : index
      %c0_99 = arith.constant 0 : index
      %147 = vector.load %arg23[%c0_98, %c3, %c0_99] : memref<2x8x128xf32, #tpu.memory_space<vmem>>, vector<2x1x128xf32>
      %148 = vector.shape_cast %147 : vector<2x1x128xf32> to vector<2x128xf32>
      %149 = vector.shape_cast %56 : vector<2x128xf32> to vector<2x1x128xf32>
      tpu.vector_store %arg23[%c0_98, %c3, %c0_99], %149 {strides = array<i32>} : memref<2x8x128xf32, #tpu.memory_space<vmem>>, vector<2x1x128xf32>,
      %c0_100 = arith.constant 0 : index
      %c4 = arith.constant 4 : index
      %c0_101 = arith.constant 0 : index
      %150 = vector.load %arg23[%c0_100, %c4, %c0_101] : memref<2x8x128xf32, #tpu.memory_space<vmem>>, vector<2x1x128xf32>
      %151 = vector.shape_cast %150 : vector<2x1x128xf32> to vector<2x128xf32>
      %152 = vector.shape_cast %34 : vector<2x128xf32> to vector<2x1x128xf32>
      tpu.vector_store %arg23[%c0_100, %c4, %c0_101], %152 {strides = array<i32>} : memref<2x8x128xf32, #tpu.memory_space<vmem>>, vector<2x1x128xf32>,
      %c0_102 = arith.constant 0 : index
      %c5 = arith.constant 5 : index
      %c0_103 = arith.constant 0 : index
      %153 = vector.load %arg23[%c0_102, %c5, %c0_103] : memref<2x8x128xf32, #tpu.memory_space<vmem>>, vector<2x1x128xf32>
      %154 = vector.shape_cast %153 : vector<2x1x128xf32> to vector<2x128xf32>
      %155 = vector.shape_cast %137 : vector<2x128xf32> to vector<2x1x128xf32>
      tpu.vector_store %arg23[%c0_102, %c5, %c0_103], %155 {strides = array<i32>} : memref<2x8x128xf32, #tpu.memory_space<vmem>>, vector<2x1x128xf32>,
      %c0_104 = arith.constant 0 : index
      %c6 = arith.constant 6 : index
      %c0_105 = arith.constant 0 : index
      %156 = vector.load %arg23[%c0_104, %c6, %c0_105] : memref<2x8x128xf32, #tpu.memory_space<vmem>>, vector<2x1x128xf32>
      %157 = vector.shape_cast %156 : vector<2x1x128xf32> to vector<2x128xf32>
      %158 = vector.shape_cast %137 : vector<2x128xf32> to vector<2x1x128xf32>
      tpu.vector_store %arg23[%c0_104, %c6, %c0_105], %158 {strides = array<i32>} : memref<2x8x128xf32, #tpu.memory_space<vmem>>, vector<2x1x128xf32>,
      %c0_106 = arith.constant 0 : index
      %c7 = arith.constant 7 : index
      %c0_107 = arith.constant 0 : index
      %159 = vector.load %arg23[%c0_106, %c7, %c0_107] : memref<2x8x128xf32, #tpu.memory_space<vmem>>, vector<2x1x128xf32>
      %160 = vector.shape_cast %159 : vector<2x1x128xf32> to vector<2x128xf32>
      %161 = vector.shape_cast %137 : vector<2x128xf32> to vector<2x1x128xf32>
      tpu.vector_store %arg23[%c0_106, %c7, %c0_107], %161 {strides = array<i32>} : memref<2x8x128xf32, #tpu.memory_space<vmem>>, vector<2x1x128xf32>,
    } else {
    }
    return
  }
  func.func @transform_0(%arg0: i32, %arg1: i32) -> (i32, i32, i32) {
    %c0_i32 = arith.constant 0 : i32
    %c0_i32_0 = arith.constant 0 : i32
    return %arg0, %arg1, %c0_i32 : i32, i32, i32
  }
  func.func @transform_1(%arg0: i32, %arg1: i32) -> (i32, i32, i32) {
    %c0_i32 = arith.constant 0 : i32
    %c0_i32_0 = arith.constant 0 : i32
    %c0_i32_1 = arith.constant 0 : i32
    return %arg0, %c0_i32, %c0_i32_0 : i32, i32, i32
  }
  func.func @transform_2(%arg0: i32, %arg1: i32) -> (i32, i32) {
    %c0_i32 = arith.constant 0 : i32
    %c0_i32_0 = arith.constant 0 : i32
    %c0_i32_1 = arith.constant 0 : i32
    return %c0_i32, %c0_i32_0 : i32, i32
  }
  func.func @transform_3(%arg0: i32, %arg1: i32) -> (i32, i32) {
    %c0_i32 = arith.constant 0 : i32
    %c0_i32_0 = arith.constant 0 : i32
    %c0_i32_1 = arith.constant 0 : i32
    return %c0_i32, %c0_i32_0 : i32, i32
  }
  func.func @transform_4(%arg0: i32, %arg1: i32) -> (i32, i32) {
    %c0_i32 = arith.constant 0 : i32
    %c0_i32_0 = arith.constant 0 : i32
    %c0_i32_1 = arith.constant 0 : i32
    return %c0_i32, %c0_i32_0 : i32, i32
  }
  func.func @transform_5(%arg0: i32, %arg1: i32) -> (i32, i32) {
    %c0_i32 = arith.constant 0 : i32
    %c0_i32_0 = arith.constant 0 : i32
    %c0_i32_1 = arith.constant 0 : i32
    return %c0_i32, %c0_i32_0 : i32, i32
  }
  func.func @transform_6(%arg0: i32, %arg1: i32) -> (i32, i32) {
    %c0_i32 = arith.constant 0 : i32
    %c0_i32_0 = arith.constant 0 : i32
    %c0_i32_1 = arith.constant 0 : i32
    return %c0_i32, %c0_i32_0 : i32, i32
  }
  func.func @transform_7(%arg0: i32, %arg1: i32) -> (i32, i32) {
    %c0_i32 = arith.constant 0 : i32
    %c0_i32_0 = arith.constant 0 : i32
    %c0_i32_1 = arith.constant 0 : i32
    return %c0_i32, %c0_i32_0 : i32, i32
  }
  func.func @transform_8(%arg0: i32, %arg1: i32) -> (i32, i32) {
    %c0_i32 = arith.constant 0 : i32
    %c0_i32_0 = arith.constant 0 : i32
    %c0_i32_1 = arith.constant 0 : i32
    return %c0_i32, %c0_i32_0 : i32, i32
  }
  func.func @transform_9(%arg0: i32, %arg1: i32) -> (i32, i32) {
    %c0_i32 = arith.constant 0 : i32
    %c0_i32_0 = arith.constant 0 : i32
    %c0_i32_1 = arith.constant 0 : i32
    return %c0_i32, %c0_i32_0 : i32, i32
  }
  func.func @transform_10(%arg0: i32, %arg1: i32) -> (i32, i32) {
    %c0_i32 = arith.constant 0 : i32
    %c0_i32_0 = arith.constant 0 : i32
    %c0_i32_1 = arith.constant 0 : i32
    return %c0_i32, %c0_i32_0 : i32, i32
  }
  func.func @transform_11(%arg0: i32, %arg1: i32) -> (i32, i32) {
    %c0_i32 = arith.constant 0 : i32
    %c0_i32_0 = arith.constant 0 : i32
    %c0_i32_1 = arith.constant 0 : i32
    return %c0_i32, %c0_i32_0 : i32, i32
  }
  func.func @transform_12(%arg0: i32, %arg1: i32) -> (i32, i32) {
    %c0_i32 = arith.constant 0 : i32
    %c0_i32_0 = arith.constant 0 : i32
    %c0_i32_1 = arith.constant 0 : i32
    return %c0_i32, %c0_i32_0 : i32, i32
  }
  func.func @transform_13(%arg0: i32, %arg1: i32) -> (i32, i32) {
    %c0_i32 = arith.constant 0 : i32
    %c0_i32_0 = arith.constant 0 : i32
    %c0_i32_1 = arith.constant 0 : i32
    return %c0_i32, %c0_i32_0 : i32, i32
  }
  func.func @transform_14(%arg0: i32, %arg1: i32) -> (i32, i32) {
    %c0_i32 = arith.constant 0 : i32
    %c0_i32_0 = arith.constant 0 : i32
    %c0_i32_1 = arith.constant 0 : i32
    return %c0_i32, %c0_i32_0 : i32, i32
  }
  func.func @transform_15(%arg0: i32, %arg1: i32) -> (i32, i32) {
    %c0_i32 = arith.constant 0 : i32
    %c0_i32_0 = arith.constant 0 : i32
    %c0_i32_1 = arith.constant 0 : i32
    return %c0_i32, %c0_i32_0 : i32, i32
  }
  func.func @transform_16(%arg0: i32, %arg1: i32) -> (i32, i32) {
    %c0_i32 = arith.constant 0 : i32
    %c0_i32_0 = arith.constant 0 : i32
    %c0_i32_1 = arith.constant 0 : i32
    return %c0_i32, %c0_i32_0 : i32, i32
  }
  func.func @transform_17(%arg0: i32, %arg1: i32) -> (i32, i32) {
    %c0_i32 = arith.constant 0 : i32
    %c0_i32_0 = arith.constant 0 : i32
    %c0_i32_1 = arith.constant 0 : i32
    return %c0_i32, %c0_i32_0 : i32, i32
  }
  func.func @transform_18(%arg0: i32, %arg1: i32) -> (i32, i32) {
    %c0_i32 = arith.constant 0 : i32
    %c0_i32_0 = arith.constant 0 : i32
    %c0_i32_1 = arith.constant 0 : i32
    return %c0_i32, %c0_i32_0 : i32, i32
  }
  func.func @transform_19(%arg0: i32, %arg1: i32) -> (i32, i32) {
    %c0_i32 = arith.constant 0 : i32
    %c0_i32_0 = arith.constant 0 : i32
    %c0_i32_1 = arith.constant 0 : i32
    return %c0_i32, %c0_i32_0 : i32, i32
  }
  func.func @transform_20(%arg0: i32, %arg1: i32) -> (i32, i32) {
    %c0_i32 = arith.constant 0 : i32
    %c0_i32_0 = arith.constant 0 : i32
    %c0_i32_1 = arith.constant 0 : i32
    return %c0_i32, %c0_i32_0 : i32, i32
  }
  func.func @transform_21(%arg0: i32, %arg1: i32) -> (i32, i32, i32) {
    %c0_i32 = arith.constant 0 : i32
    %c0_i32_0 = arith.constant 0 : i32
    %c0_i32_1 = arith.constant 0 : i32
    return %arg0, %c0_i32, %c0_i32_0 : i32, i32, i32
  }
}

module attributes {stable_mosaic.version = 11 : i64} {
  func.func @_fused_whisper_poe_kernel(%arg0: i32, %arg1: i32, %arg2: memref<2x16x32xbf16, #tpu.memory_space<vmem>>, %arg3: memref<2x1x10xf32, #tpu.memory_space<vmem>>, %arg4: memref<32x32xbf16, #tpu.memory_space<vmem>>, %arg5: memref<1x32xf32, #tpu.memory_space<vmem>>, %arg6: memref<32x16xbf16, #tpu.memory_space<vmem>>, %arg7: memref<1x16xf32, #tpu.memory_space<vmem>>, %arg8: memref<16x128xbf16, #tpu.memory_space<vmem>>, %arg9: memref<1x128xf32, #tpu.memory_space<vmem>>, %arg10: memref<10x10xbf16, #tpu.memory_space<vmem>>, %arg11: memref<1x10xf32, #tpu.memory_space<vmem>>, %arg12: memref<10x5xbf16, #tpu.memory_space<vmem>>, %arg13: memref<1x5xf32, #tpu.memory_space<vmem>>, %arg14: memref<5x128xbf16, #tpu.memory_space<vmem>>, %arg15: memref<1x128xf32, #tpu.memory_space<vmem>>, %arg16: memref<32x21xbf16, #tpu.memory_space<vmem>>, %arg17: memref<10x21xbf16, #tpu.memory_space<vmem>>, %arg18: memref<1x21xf32, #tpu.memory_space<vmem>>, %arg19: memref<21x10xbf16, #tpu.memory_space<vmem>>, %arg20: memref<1x10xf32, #tpu.memory_space<vmem>>, %arg21: memref<10x128xbf16, #tpu.memory_space<vmem>>, %arg22: memref<1x128xf32, #tpu.memory_space<vmem>>, %arg23: memref<2x8x128xf32, #tpu.memory_space<vmem>>, %arg24: memref<2x32xf32, #tpu.memory_space<vmem>>) attributes {dimension_semantics = [#tpu.dimension_semantics<parallel>, #tpu.dimension_semantics<arbitrary>], iteration_bounds = array<i64: 1, 1>, scalar_prefetch = 0 : i64, scratch_operands = 1 : i64, tpu.core_type = #tpu.core_type<tc>, window_params = [{transform_indices = @transform_0, window_bounds = array<i64: 2, 16, 32>}, {transform_indices = @transform_1, window_bounds = array<i64: 2, 1, 10>}, {pipeline_mode = #tpu.pipeline_mode<synchronous>, transform_indices = @transform_2, window_bounds = array<i64: 32, 32>}, {pipeline_mode = #tpu.pipeline_mode<synchronous>, transform_indices = @transform_3, window_bounds = array<i64: 1, 32>}, {pipeline_mode = #tpu.pipeline_mode<synchronous>, transform_indices = @transform_4, window_bounds = array<i64: 32, 16>}, {pipeline_mode = #tpu.pipeline_mode<synchronous>, transform_indices = @transform_5, window_bounds = array<i64: 1, 16>}, {pipeline_mode = #tpu.pipeline_mode<synchronous>, transform_indices = @transform_6, window_bounds = array<i64: 16, 128>}, {pipeline_mode = #tpu.pipeline_mode<synchronous>, transform_indices = @transform_7, window_bounds = array<i64: 1, 128>}, {pipeline_mode = #tpu.pipeline_mode<synchronous>, transform_indices = @transform_8, window_bounds = array<i64: 10, 10>}, {pipeline_mode = #tpu.pipeline_mode<synchronous>, transform_indices = @transform_9, window_bounds = array<i64: 1, 10>}, {pipeline_mode = #tpu.pipeline_mode<synchronous>, transform_indices = @transform_10, window_bounds = array<i64: 10, 5>}, {pipeline_mode = #tpu.pipeline_mode<synchronous>, transform_indices = @transform_11, window_bounds = array<i64: 1, 5>}, {pipeline_mode = #tpu.pipeline_mode<synchronous>, transform_indices = @transform_12, window_bounds = array<i64: 5, 128>}, {pipeline_mode = #tpu.pipeline_mode<synchronous>, transform_indices = @transform_13, window_bounds = array<i64: 1, 128>}, {pipeline_mode = #tpu.pipeline_mode<synchronous>, transform_indices = @transform_14, window_bounds = array<i64: 32, 21>}, {pipeline_mode = #tpu.pipeline_mode<synchronous>, transform_indices = @transform_15, window_bounds = array<i64: 10, 21>}, {pipeline_mode = #tpu.pipeline_mode<synchronous>, transform_indices = @transform_16, window_bounds = array<i64: 1, 21>}, {pipeline_mode = #tpu.pipeline_mode<synchronous>, transform_indices = @transform_17, window_bounds = array<i64: 21, 10>}, {pipeline_mode = #tpu.pipeline_mode<synchronous>, transform_indices = @transform_18, window_bounds = array<i64: 1, 10>}, {pipeline_mode = #tpu.pipeline_mode<synchronous>, transform_indices = @transform_19, window_bounds = array<i64: 10, 128>}, {pipeline_mode = #tpu.pipeline_mode<synchronous>, transform_indices = @transform_20, window_bounds = array<i64: 1, 128>}, {transform_indices = @transform_21, window_bounds = array<i64: 2, 8, 128>}]} {
    %c0_i32 = arith.constant 0 : i32
    %0 = arith.cmpi eq, %arg1, %c0_i32 : i32
    %1 = arith.extui %0 : i1 to i32
    %c0_i32_0 = arith.constant 0 : i32
    %2 = arith.cmpi ne, %1, %c0_i32_0 : i32
    scf.if %2 {
      %cst_9 = arith.constant 0.000000e+00 : f32
      %12 = vector.broadcast %cst_9 : f32 to vector<2x32xf32>
      %c0_10 = arith.constant 0 : index
      %c0_11 = arith.constant 0 : index
      %13 = vector.load %arg24[%c0_10, %c0_11] : memref<2x32xf32, #tpu.memory_space<vmem>>, vector<2x32xf32>
      tpu.vector_store %arg24[%c0_10, %c0_11], %12 {strides = array<i32>} : memref<2x32xf32, #tpu.memory_space<vmem>>, vector<2x32xf32>,
    } else {
    }
    %c0 = arith.constant 0 : index
    %c0_1 = arith.constant 0 : index
    %c0_2 = arith.constant 0 : index
    %3 = vector.load %arg2[%c0, %c0_1, %c0_2] : memref<2x16x32xbf16, #tpu.memory_space<vmem>>, vector<2x16x32xbf16>
    %4 = arith.extf %3 : vector<2x16x32xbf16> to vector<2x16x32xf32>
    %c0_3 = arith.constant 0 : index
    %c0_4 = arith.constant 0 : index
    %5 = vector.load %arg24[%c0_3, %c0_4] : memref<2x32xf32, #tpu.memory_space<vmem>>, vector<2x32xf32>
    %cst = arith.constant dense<0.000000e+00> : vector<2x32xf32>
    %6 = vector.multi_reduction <add>, %4, %cst [1] : vector<2x16x32xf32> to vector<2x32xf32>
    %7 = arith.addf %5, %6 : vector<2x32xf32>
    %c0_5 = arith.constant 0 : index
    %c0_6 = arith.constant 0 : index
    %8 = vector.load %arg24[%c0_5, %c0_6] : memref<2x32xf32, #tpu.memory_space<vmem>>, vector<2x32xf32>
    tpu.vector_store %arg24[%c0_5, %c0_6], %7 {strides = array<i32>} : memref<2x32xf32, #tpu.memory_space<vmem>>, vector<2x32xf32>,
    %c0_i32_7 = arith.constant 0 : i32
    %9 = arith.cmpi eq, %arg1, %c0_i32_7 : i32
    %10 = arith.extui %9 : i1 to i32
    %c0_i32_8 = arith.constant 0 : i32
    %11 = arith.cmpi ne, %10, %c0_i32_8 : i32
    scf.if %11 {
      %c0_9 = arith.constant 0 : index
      %c0_10 = arith.constant 0 : index
      %12 = vector.load %arg24[%c0_9, %c0_10] : memref<2x32xf32, #tpu.memory_space<vmem>>, vector<2x32xf32>
      %cst_11 = arith.constant 6.250000e-02 : f32
      %13 = vector.broadcast %cst_11 : f32 to vector<2x32xf32>
      %14 = arith.mulf %12, %13 : vector<2x32xf32>
      %15 = arith.truncf %14 : vector<2x32xf32> to vector<2x32xbf16>
      %c0_12 = arith.constant 0 : index
      %c0_13 = arith.constant 0 : index
      %16 = vector.load %arg4[%c0_12, %c0_13] : memref<32x32xbf16, #tpu.memory_space<vmem>>, vector<32x32xbf16>
      %cst_14 = arith.constant dense<0.000000e+00> : vector<2x32xf32>
      %17 = tpu.matmul %15, %16, %cst_14 {dimension_numbers = #tpu.dot_dimension_numbers<[1], [0], [0], [1], [0, 0, 1, 1], [], []>} : vector<2x32xbf16>, vector<32x32xbf16>, vector<2x32xf32> -> vector<2x32xf32>
      %c0_15 = arith.constant 0 : index
      %c0_16 = arith.constant 0 : index
      %18 = vector.load %arg5[%c0_15, %c0_16] : memref<1x32xf32, #tpu.memory_space<vmem>>, vector<1x32xf32>
      %19 = vector.broadcast %18 : vector<1x32xf32> to vector<2x32xf32>
      %20 = arith.addf %17, %19 : vector<2x32xf32>
      %21 = arith.truncf %20 : vector<2x32xf32> to vector<2x32xbf16>
      %c0_17 = arith.constant 0 : index
      %c0_18 = arith.constant 0 : index
      %22 = vector.load %arg6[%c0_17, %c0_18] : memref<32x16xbf16, #tpu.memory_space<vmem>>, vector<32x16xbf16>
      %cst_19 = arith.constant dense<0.000000e+00> : vector<2x16xf32>
      %23 = tpu.matmul %21, %22, %cst_19 {dimension_numbers = #tpu.dot_dimension_numbers<[1], [0], [0], [1], [0, 0, 1, 1], [], []>} : vector<2x32xbf16>, vector<32x16xbf16>, vector<2x16xf32> -> vector<2x16xf32>
      %c0_20 = arith.constant 0 : index
      %c0_21 = arith.constant 0 : index
      %24 = vector.load %arg7[%c0_20, %c0_21] : memref<1x16xf32, #tpu.memory_space<vmem>>, vector<1x16xf32>
      %25 = vector.broadcast %24 : vector<1x16xf32> to vector<2x16xf32>
      %26 = arith.addf %23, %25 : vector<2x16xf32>
      %cst_22 = arith.constant 0.000000e+00 : f32
      %27 = vector.broadcast %cst_22 : f32 to vector<2x16xf32>
      %28 = arith.maximumf %26, %27 : vector<2x16xf32>
      %29 = arith.truncf %28 : vector<2x16xf32> to vector<2x16xbf16>
      %c0_23 = arith.constant 0 : index
      %c0_24 = arith.constant 0 : index
      %30 = vector.load %arg8[%c0_23, %c0_24] : memref<16x128xbf16, #tpu.memory_space<vmem>>, vector<16x128xbf16>
      %cst_25 = arith.constant dense<0.000000e+00> : vector<2x128xf32>
      %31 = tpu.matmul %29, %30, %cst_25 {dimension_numbers = #tpu.dot_dimension_numbers<[1], [0], [0], [1], [0, 0, 1, 1], [], []>} : vector<2x16xbf16>, vector<16x128xbf16>, vector<2x128xf32> -> vector<2x128xf32>
      %c0_26 = arith.constant 0 : index
      %c0_27 = arith.constant 0 : index
      %32 = vector.load %arg9[%c0_26, %c0_27] : memref<1x128xf32, #tpu.memory_space<vmem>>, vector<1x128xf32>
      %33 = vector.broadcast %32 : vector<1x128xf32> to vector<2x128xf32>
      %34 = arith.addf %31, %33 : vector<2x128xf32>
      %c0_28 = arith.constant 0 : index
      %c0_29 = arith.constant 0 : index
      %c0_30 = arith.constant 0 : index
      %35 = vector.load %arg3[%c0_28, %c0_29, %c0_30] : memref<2x1x10xf32, #tpu.memory_space<vmem>>, vector<2x1x10xf32>
      %36 = vector.shape_cast %35 : vector<2x1x10xf32> to vector<2x10xf32>
      %37 = arith.truncf %36 : vector<2x10xf32> to vector<2x10xbf16>
      %c0_31 = arith.constant 0 : index
      %c0_32 = arith.constant 0 : index
      %38 = vector.load %arg10[%c0_31, %c0_32] : memref<10x10xbf16, #tpu.memory_space<vmem>>, vector<10x10xbf16>
      %cst_33 = arith.constant dense<0.000000e+00> : vector<2x10xf32>
      %39 = tpu.matmul %37, %38, %cst_33 {dimension_numbers = #tpu.dot_dimension_numbers<[1], [0], [0], [1], [0, 0, 1, 1], [], []>} : vector<2x10xbf16>, vector<10x10xbf16>, vector<2x10xf32> -> vector<2x10xf32>
      %c0_34 = arith.constant 0 : index
      %c0_35 = arith.constant 0 : index
      %40 = vector.load %arg11[%c0_34, %c0_35] : memref<1x10xf32, #tpu.memory_space<vmem>>, vector<1x10xf32>
      %41 = vector.broadcast %40 : vector<1x10xf32> to vector<2x10xf32>
      %42 = arith.addf %39, %41 : vector<2x10xf32>
      %43 = arith.truncf %42 : vector<2x10xf32> to vector<2x10xbf16>
      %c0_36 = arith.constant 0 : index
      %c0_37 = arith.constant 0 : index
      %44 = vector.load %arg12[%c0_36, %c0_37] : memref<10x5xbf16, #tpu.memory_space<vmem>>, vector<10x5xbf16>
      %cst_38 = arith.constant dense<0.000000e+00> : vector<2x5xf32>
      %45 = tpu.matmul %43, %44, %cst_38 {dimension_numbers = #tpu.dot_dimension_numbers<[1], [0], [0], [1], [0, 0, 1, 1], [], []>} : vector<2x10xbf16>, vector<10x5xbf16>, vector<2x5xf32> -> vector<2x5xf32>
      %c0_39 = arith.constant 0 : index
      %c0_40 = arith.constant 0 : index
      %46 = vector.load %arg13[%c0_39, %c0_40] : memref<1x5xf32, #tpu.memory_space<vmem>>, vector<1x5xf32>
      %47 = vector.broadcast %46 : vector<1x5xf32> to vector<2x5xf32>
      %48 = arith.addf %45, %47 : vector<2x5xf32>
      %cst_41 = arith.constant 0.000000e+00 : f32
      %49 = vector.broadcast %cst_41 : f32 to vector<2x5xf32>
      %50 = arith.maximumf %48, %49 : vector<2x5xf32>
      %51 = arith.truncf %50 : vector<2x5xf32> to vector<2x5xbf16>
      %c0_42 = arith.constant 0 : index
      %c0_43 = arith.constant 0 : index
      %52 = vector.load %arg14[%c0_42, %c0_43] : memref<5x128xbf16, #tpu.memory_space<vmem>>, vector<5x128xbf16>
      %cst_44 = arith.constant dense<0.000000e+00> : vector<2x128xf32>
      %53 = tpu.matmul %51, %52, %cst_44 {dimension_numbers = #tpu.dot_dimension_numbers<[1], [0], [0], [1], [0, 0, 1, 1], [], []>} : vector<2x5xbf16>, vector<5x128xbf16>, vector<2x128xf32> -> vector<2x128xf32>
      %c0_45 = arith.constant 0 : index
      %c0_46 = arith.constant 0 : index
      %54 = vector.load %arg15[%c0_45, %c0_46] : memref<1x128xf32, #tpu.memory_space<vmem>>, vector<1x128xf32>
      %55 = vector.broadcast %54 : vector<1x128xf32> to vector<2x128xf32>
      %56 = arith.addf %53, %55 : vector<2x128xf32>
      %57 = arith.truncf %20 : vector<2x32xf32> to vector<2x32xbf16>
      %c0_47 = arith.constant 0 : index
      %c0_48 = arith.constant 0 : index
      %58 = vector.load %arg16[%c0_47, %c0_48] : memref<32x21xbf16, #tpu.memory_space<vmem>>, vector<32x21xbf16>
      %cst_49 = arith.constant dense<0.000000e+00> : vector<2x21xf32>
      %59 = tpu.matmul %57, %58, %cst_49 {dimension_numbers = #tpu.dot_dimension_numbers<[1], [0], [0], [1], [0, 0, 1, 1], [], []>} : vector<2x32xbf16>, vector<32x21xbf16>, vector<2x21xf32> -> vector<2x21xf32>
      %60 = arith.truncf %42 : vector<2x10xf32> to vector<2x10xbf16>
      %c0_50 = arith.constant 0 : index
      %c0_51 = arith.constant 0 : index
      %61 = vector.load %arg17[%c0_50, %c0_51] : memref<10x21xbf16, #tpu.memory_space<vmem>>, vector<10x21xbf16>
      %cst_52 = arith.constant dense<0.000000e+00> : vector<2x21xf32>
      %62 = tpu.matmul %60, %61, %cst_52 {dimension_numbers = #tpu.dot_dimension_numbers<[1], [0], [0], [1], [0, 0, 1, 1], [], []>} : vector<2x10xbf16>, vector<10x21xbf16>, vector<2x21xf32> -> vector<2x21xf32>
      %63 = arith.addf %59, %62 : vector<2x21xf32>
      %c0_53 = arith.constant 0 : index
      %c0_54 = arith.constant 0 : index
      %64 = vector.load %arg18[%c0_53, %c0_54] : memref<1x21xf32, #tpu.memory_space<vmem>>, vector<1x21xf32>
      %65 = vector.broadcast %64 : vector<1x21xf32> to vector<2x21xf32>
      %66 = arith.addf %63, %65 : vector<2x21xf32>
      %cst_55 = arith.constant 0.000000e+00 : f32
      %67 = vector.broadcast %cst_55 : f32 to vector<2x21xf32>
      %68 = arith.maximumf %66, %67 : vector<2x21xf32>
      %69 = arith.truncf %68 : vector<2x21xf32> to vector<2x21xbf16>
      %c0_56 = arith.constant 0 : index
      %c0_57 = arith.constant 0 : index
      %70 = vector.load %arg19[%c0_56, %c0_57] : memref<21x10xbf16, #tpu.memory_space<vmem>>, vector<21x10xbf16>
      %cst_58 = arith.constant dense<0.000000e+00> : vector<2x10xf32>
      %71 = tpu.matmul %69, %70, %cst_58 {dimension_numbers = #tpu.dot_dimension_numbers<[1], [0], [0], [1], [0, 0, 1, 1], [], []>} : vector<2x21xbf16>, vector<21x10xbf16>, vector<2x10xf32> -> vector<2x10xf32>
      %c0_59 = arith.constant 0 : index
      %c0_60 = arith.constant 0 : index
      %72 = vector.load %arg20[%c0_59, %c0_60] : memref<1x10xf32, #tpu.memory_space<vmem>>, vector<1x10xf32>
      %73 = vector.broadcast %72 : vector<1x10xf32> to vector<2x10xf32>
      %74 = arith.addf %71, %73 : vector<2x10xf32>
      %75 = arith.truncf %74 : vector<2x10xf32> to vector<2x10xbf16>
      %c0_61 = arith.constant 0 : index
      %c0_62 = arith.constant 0 : index
      %76 = vector.load %arg21[%c0_61, %c0_62] : memref<10x128xbf16, #tpu.memory_space<vmem>>, vector<10x128xbf16>
      %cst_63 = arith.constant dense<0.000000e+00> : vector<2x128xf32>
      %77 = tpu.matmul %75, %76, %cst_63 {dimension_numbers = #tpu.dot_dimension_numbers<[1], [0], [0], [1], [0, 0, 1, 1], [], []>} : vector<2x10xbf16>, vector<10x128xbf16>, vector<2x128xf32> -> vector<2x128xf32>
      %c0_64 = arith.constant 0 : index
      %c0_65 = arith.constant 0 : index
      %78 = vector.load %arg22[%c0_64, %c0_65] : memref<1x128xf32, #tpu.memory_space<vmem>>, vector<1x128xf32>
      %79 = vector.broadcast %78 : vector<1x128xf32> to vector<2x128xf32>
      %80 = arith.addf %77, %79 : vector<2x128xf32>
      %81 = arith.truncf %20 : vector<2x32xf32> to vector<2x32xbf16>
      %c0_66 = arith.constant 0 : index
      %c0_67 = arith.constant 0 : index
      %82 = vector.load %arg4[%c0_66, %c0_67] : memref<32x32xbf16, #tpu.memory_space<vmem>>, vector<32x32xbf16>
      %cst_68 = arith.constant dense<0.000000e+00> : vector<2x32xf32>
      %83 = tpu.matmul %81, %82, %cst_68 {dimension_numbers = #tpu.dot_dimension_numbers<[1], [0], [0], [1], [0, 0, 1, 1], [], []>} : vector<2x32xbf16>, vector<32x32xbf16>, vector<2x32xf32> -> vector<2x32xf32>
      %c0_69 = arith.constant 0 : index
      %c0_70 = arith.constant 0 : index
      %84 = vector.load %arg5[%c0_69, %c0_70] : memref<1x32xf32, #tpu.memory_space<vmem>>, vector<1x32xf32>
      %85 = vector.broadcast %84 : vector<1x32xf32> to vector<2x32xf32>
      %86 = arith.addf %83, %85 : vector<2x32xf32>
      %87 = arith.truncf %86 : vector<2x32xf32> to vector<2x32xbf16>
      %c0_71 = arith.constant 0 : index
      %c0_72 = arith.constant 0 : index
      %88 = vector.load %arg6[%c0_71, %c0_72] : memref<32x16xbf16, #tpu.memory_space<vmem>>, vector<32x16xbf16>
      %cst_73 = arith.constant dense<0.000000e+00> : vector<2x16xf32>
      %89 = tpu.matmul %87, %88, %cst_73 {dimension_numbers = #tpu.dot_dimension_numbers<[1], [0], [0], [1], [0, 0, 1, 1], [], []>} : vector<2x32xbf16>, vector<32x16xbf16>, vector<2x16xf32> -> vector<2x16xf32>
      %c0_74 = arith.constant 0 : index
      %c0_75 = arith.constant 0 : index
      %90 = vector.load %arg7[%c0_74, %c0_75] : memref<1x16xf32, #tpu.memory_space<vmem>>, vector<1x16xf32>
      %91 = vector.broadcast %90 : vector<1x16xf32> to vector<2x16xf32>
      %92 = arith.addf %89, %91 : vector<2x16xf32>
      %cst_76 = arith.constant 0.000000e+00 : f32
      %93 = vector.broadcast %cst_76 : f32 to vector<2x16xf32>
      %94 = arith.maximumf %92, %93 : vector<2x16xf32>
      %95 = arith.truncf %94 : vector<2x16xf32> to vector<2x16xbf16>
      %c0_77 = arith.constant 0 : index
      %c0_78 = arith.constant 0 : index
      %96 = vector.load %arg8[%c0_77, %c0_78] : memref<16x128xbf16, #tpu.memory_space<vmem>>, vector<16x128xbf16>
      %cst_79 = arith.constant dense<0.000000e+00> : vector<2x128xf32>
      %97 = tpu.matmul %95, %96, %cst_79 {dimension_numbers = #tpu.dot_dimension_numbers<[1], [0], [0], [1], [0, 0, 1, 1], [], []>} : vector<2x16xbf16>, vector<16x128xbf16>, vector<2x128xf32> -> vector<2x128xf32>
      %c0_80 = arith.constant 0 : index
      %c0_81 = arith.constant 0 : index
      %98 = vector.load %arg9[%c0_80, %c0_81] : memref<1x128xf32, #tpu.memory_space<vmem>>, vector<1x128xf32>
      %99 = vector.broadcast %98 : vector<1x128xf32> to vector<2x128xf32>
      %100 = arith.addf %97, %99 : vector<2x128xf32>
      %cst_82 = arith.constant dense<0xFF800000> : vector<2xf32>
      %101 = vector.multi_reduction <maximumf>, %80, %cst_82 [1] : vector<2x128xf32> to vector<2xf32>
      %102 = vector.shape_cast %101 : vector<2xf32> to vector<2x1xf32>
      %103 = vector.broadcast %102 : vector<2x1xf32> to vector<2x128xf32>
      %104 = arith.subf %80, %103 : vector<2x128xf32>
      %105 = math.exp %104 : vector<2x128xf32>
      %cst_83 = arith.constant dense<0.000000e+00> : vector<2xf32>
      %106 = vector.multi_reduction <add>, %105, %cst_83 [1] : vector<2x128xf32> to vector<2xf32>
      %107 = vector.shape_cast %106 : vector<2xf32> to vector<2x1xf32>
      %108 = math.log %107 : vector<2x1xf32>
      %109 = vector.broadcast %108 : vector<2x1xf32> to vector<2x128xf32>
      %110 = arith.subf %104, %109 : vector<2x128xf32>
      %cst_84 = arith.constant dense<0xFF800000> : vector<2xf32>
      %111 = vector.multi_reduction <maximumf>, %100, %cst_84 [1] : vector<2x128xf32> to vector<2xf32>
      %112 = vector.shape_cast %111 : vector<2xf32> to vector<2x1xf32>
      %113 = vector.broadcast %112 : vector<2x1xf32> to vector<2x128xf32>
      %114 = arith.subf %100, %113 : vector<2x128xf32>
      %115 = math.exp %114 : vector<2x128xf32>
      %cst_85 = arith.constant dense<0.000000e+00> : vector<2xf32>
      %116 = vector.multi_reduction <add>, %115, %cst_85 [1] : vector<2x128xf32> to vector<2xf32>
      %117 = vector.shape_cast %116 : vector<2xf32> to vector<2x1xf32>
      %118 = math.log %117 : vector<2x1xf32>
      %119 = vector.broadcast %118 : vector<2x1xf32> to vector<2x128xf32>
      %120 = arith.subf %114, %119 : vector<2x128xf32>
      %cst_86 = arith.constant 5.000000e-01 : f32
      %121 = vector.broadcast %cst_86 : f32 to vector<2x128xf32>
      %122 = arith.mulf %121, %120 : vector<2x128xf32>
      %123 = arith.addf %110, %122 : vector<2x128xf32>
      %cst_87 = arith.constant dense<0xFF800000> : vector<2xf32>
      %124 = vector.multi_reduction <maximumf>, %56, %cst_87 [1] : vector<2x128xf32> to vector<2xf32>
      %125 = vector.shape_cast %124 : vector<2xf32> to vector<2x1xf32>
      %126 = vector.broadcast %125 : vector<2x1xf32> to vector<2x128xf32>
      %127 = arith.subf %56, %126 : vector<2x128xf32>
      %128 = math.exp %127 : vector<2x128xf32>
      %cst_88 = arith.constant dense<0.000000e+00> : vector<2xf32>
      %129 = vector.multi_reduction <add>, %128, %cst_88 [1] : vector<2x128xf32> to vector<2xf32>
      %130 = vector.shape_cast %129 : vector<2xf32> to vector<2x1xf32>
      %131 = math.log %130 : vector<2x1xf32>
      %132 = vector.broadcast %131 : vector<2x1xf32> to vector<2x128xf32>
      %133 = arith.subf %127, %132 : vector<2x128xf32>
      %cst_89 = arith.constant 5.000000e-01 : f32
      %134 = vector.broadcast %cst_89 : f32 to vector<2x128xf32>
      %135 = arith.mulf %134, %133 : vector<2x128xf32>
      %136 = arith.addf %123, %135 : vector<2x128xf32>
      %cst_90 = arith.constant 0.000000e+00 : f32
      %137 = vector.broadcast %cst_90 : f32 to vector<2x128xf32>
      %c0_91 = arith.constant 0 : index
      %c0_92 = arith.constant 0 : index
      %c0_93 = arith.constant 0 : index
      %138 = vector.load %arg23[%c0_91, %c0_92, %c0_93] : memref<2x8x128xf32, #tpu.memory_space<vmem>>, vector<2x1x128xf32>
      %139 = vector.shape_cast %138 : vector<2x1x128xf32> to vector<2x128xf32>
      %140 = vector.shape_cast %136 : vector<2x128xf32> to vector<2x1x128xf32>
      tpu.vector_store %arg23[%c0_91, %c0_92, %c0_93], %140 {strides = array<i32>} : memref<2x8x128xf32, #tpu.memory_space<vmem>>, vector<2x1x128xf32>,
      %c0_94 = arith.constant 0 : index
      %c1 = arith.constant 1 : index
      %c0_95 = arith.constant 0 : index
      %141 = vector.load %arg23[%c0_94, %c1, %c0_95] : memref<2x8x128xf32, #tpu.memory_space<vmem>>, vector<2x1x128xf32>
      %142 = vector.shape_cast %141 : vector<2x1x128xf32> to vector<2x128xf32>
      %143 = vector.shape_cast %80 : vector<2x128xf32> to vector<2x1x128xf32>
      tpu.vector_store %arg23[%c0_94, %c1, %c0_95], %143 {strides = array<i32>} : memref<2x8x128xf32, #tpu.memory_space<vmem>>, vector<2x1x128xf32>,
      %c0_96 = arith.constant 0 : index
      %c2 = arith.constant 2 : index
      %c0_97 = arith.constant 0 : index
      %144 = vector.load %arg23[%c0_96, %c2, %c0_97] : memref<2x8x128xf32, #tpu.memory_space<vmem>>, vector<2x1x128xf32>
      %145 = vector.shape_cast %144 : vector<2x1x128xf32> to vector<2x128xf32>
      %146 = vector.shape_cast %100 : vector<2x128xf32> to vector<2x1x128xf32>
      tpu.vector_store %arg23[%c0_96, %c2, %c0_97], %146 {strides = array<i32>} : memref<2x8x128xf32, #tpu.memory_space<vmem>>, vector<2x1x128xf32>,
      %c0_98 = arith.constant 0 : index
      %c3 = arith.constant 3 : index
      %c0_99 = arith.constant 0 : index
      %147 = vector.load %arg23[%c0_98, %c3, %c0_99] : memref<2x8x128xf32, #tpu.memory_space<vmem>>, vector<2x1x128xf32>
      %148 = vector.shape_cast %147 : vector<2x1x128xf32> to vector<2x128xf32>
      %149 = vector.shape_cast %56 : vector<2x128xf32> to vector<2x1x128xf32>
      tpu.vector_store %arg23[%c0_98, %c3, %c0_99], %149 {strides = array<i32>} : memref<2x8x128xf32, #tpu.memory_space<vmem>>, vector<2x1x128xf32>,
      %c0_100 = arith.constant 0 : index
      %c4 = arith.constant 4 : index
      %c0_101 = arith.constant 0 : index
      %150 = vector.load %arg23[%c0_100, %c4, %c0_101] : memref<2x8x128xf32, #tpu.memory_space<vmem>>, vector<2x1x128xf32>
      %151 = vector.shape_cast %150 : vector<2x1x128xf32> to vector<2x128xf32>
      %152 = vector.shape_cast %34 : vector<2x128xf32> to vector<2x1x128xf32>
      tpu.vector_store %arg23[%c0_100, %c4, %c0_101], %152 {strides = array<i32>} : memref<2x8x128xf32, #tpu.memory_space<vmem>>, vector<2x1x128xf32>,
      %c0_102 = arith.constant 0 : index
      %c5 = arith.constant 5 : index
      %c0_103 = arith.constant 0 : index
      %153 = vector.load %arg23[%c0_102, %c5, %c0_103] : memref<2x8x128xf32, #tpu.memory_space<vmem>>, vector<2x1x128xf32>
      %154 = vector.shape_cast %153 : vector<2x1x128xf32> to vector<2x128xf32>
      %155 = vector.shape_cast %137 : vector<2x128xf32> to vector<2x1x128xf32>
      tpu.vector_store %arg23[%c0_102, %c5, %c0_103], %155 {strides = array<i32>} : memref<2x8x128xf32, #tpu.memory_space<vmem>>, vector<2x1x128xf32>,
      %c0_104 = arith.constant 0 : index
      %c6 = arith.constant 6 : index
      %c0_105 = arith.constant 0 : index
      %156 = vector.load %arg23[%c0_104, %c6, %c0_105] : memref<2x8x128xf32, #tpu.memory_space<vmem>>, vector<2x1x128xf32>
      %157 = vector.shape_cast %156 : vector<2x1x128xf32> to vector<2x128xf32>
      %158 = vector.shape_cast %137 : vector<2x128xf32> to vector<2x1x128xf32>
      tpu.vector_store %arg23[%c0_104, %c6, %c0_105], %158 {strides = array<i32>} : memref<2x8x128xf32, #tpu.memory_space<vmem>>, vector<2x1x128xf32>,
      %c0_106 = arith.constant 0 : index
      %c7 = arith.constant 7 : index
      %c0_107 = arith.constant 0 : index
      %159 = vector.load %arg23[%c0_106, %c7, %c0_107] : memref<2x8x128xf32, #tpu.memory_space<vmem>>, vector<2x1x128xf32>
      %160 = vector.shape_cast %159 : vector<2x1x128xf32> to vector<2x128xf32>
      %161 = vector.shape_cast %137 : vector<2x128xf32> to vector<2x1x128xf32>
      tpu.vector_store %arg23[%c0_106, %c7, %c0_107], %161 {strides = array<i32>} : memref<2x8x128xf32, #tpu.memory_space<vmem>>, vector<2x1x128xf32>,
    } else {
    }
    return
  }
  func.func @transform_0(%arg0: i32, %arg1: i32) -> (i32, i32, i32) {
    %c0_i32 = arith.constant 0 : i32
    %c0_i32_0 = arith.constant 0 : i32
    return %arg0, %arg1, %c0_i32 : i32, i32, i32
  }
  func.func @transform_1(%arg0: i32, %arg1: i32) -> (i32, i32, i32) {
    %c0_i32 = arith.constant 0 : i32
    %c0_i32_0 = arith.constant 0 : i32
    %c0_i32_1 = arith.constant 0 : i32
    return %arg0, %c0_i32, %c0_i32_0 : i32, i32, i32
  }
  func.func @transform_2(%arg0: i32, %arg1: i32) -> (i32, i32) {
    %c0_i32 = arith.constant 0 : i32
    %c0_i32_0 = arith.constant 0 : i32
    %c0_i32_1 = arith.constant 0 : i32
    return %c0_i32, %c0_i32_0 : i32, i32
  }
  func.func @transform_3(%arg0: i32, %arg1: i32) -> (i32, i32) {
    %c0_i32 = arith.constant 0 : i32
    %c0_i32_0 = arith.constant 0 : i32
    %c0_i32_1 = arith.constant 0 : i32
    return %c0_i32, %c0_i32_0 : i32, i32
  }
  func.func @transform_4(%arg0: i32, %arg1: i32) -> (i32, i32) {
    %c0_i32 = arith.constant 0 : i32
    %c0_i32_0 = arith.constant 0 : i32
    %c0_i32_1 = arith.constant 0 : i32
    return %c0_i32, %c0_i32_0 : i32, i32
  }
  func.func @transform_5(%arg0: i32, %arg1: i32) -> (i32, i32) {
    %c0_i32 = arith.constant 0 : i32
    %c0_i32_0 = arith.constant 0 : i32
    %c0_i32_1 = arith.constant 0 : i32
    return %c0_i32, %c0_i32_0 : i32, i32
  }
  func.func @transform_6(%arg0: i32, %arg1: i32) -> (i32, i32) {
    %c0_i32 = arith.constant 0 : i32
    %c0_i32_0 = arith.constant 0 : i32
    %c0_i32_1 = arith.constant 0 : i32
    return %c0_i32, %c0_i32_0 : i32, i32
  }
  func.func @transform_7(%arg0: i32, %arg1: i32) -> (i32, i32) {
    %c0_i32 = arith.constant 0 : i32
    %c0_i32_0 = arith.constant 0 : i32
    %c0_i32_1 = arith.constant 0 : i32
    return %c0_i32, %c0_i32_0 : i32, i32
  }
  func.func @transform_8(%arg0: i32, %arg1: i32) -> (i32, i32) {
    %c0_i32 = arith.constant 0 : i32
    %c0_i32_0 = arith.constant 0 : i32
    %c0_i32_1 = arith.constant 0 : i32
    return %c0_i32, %c0_i32_0 : i32, i32
  }
  func.func @transform_9(%arg0: i32, %arg1: i32) -> (i32, i32) {
    %c0_i32 = arith.constant 0 : i32
    %c0_i32_0 = arith.constant 0 : i32
    %c0_i32_1 = arith.constant 0 : i32
    return %c0_i32, %c0_i32_0 : i32, i32
  }
  func.func @transform_10(%arg0: i32, %arg1: i32) -> (i32, i32) {
    %c0_i32 = arith.constant 0 : i32
    %c0_i32_0 = arith.constant 0 : i32
    %c0_i32_1 = arith.constant 0 : i32
    return %c0_i32, %c0_i32_0 : i32, i32
  }
  func.func @transform_11(%arg0: i32, %arg1: i32) -> (i32, i32) {
    %c0_i32 = arith.constant 0 : i32
    %c0_i32_0 = arith.constant 0 : i32
    %c0_i32_1 = arith.constant 0 : i32
    return %c0_i32, %c0_i32_0 : i32, i32
  }
  func.func @transform_12(%arg0: i32, %arg1: i32) -> (i32, i32) {
    %c0_i32 = arith.constant 0 : i32
    %c0_i32_0 = arith.constant 0 : i32
    %c0_i32_1 = arith.constant 0 : i32
    return %c0_i32, %c0_i32_0 : i32, i32
  }
  func.func @transform_13(%arg0: i32, %arg1: i32) -> (i32, i32) {
    %c0_i32 = arith.constant 0 : i32
    %c0_i32_0 = arith.constant 0 : i32
    %c0_i32_1 = arith.constant 0 : i32
    return %c0_i32, %c0_i32_0 : i32, i32
  }
  func.func @transform_14(%arg0: i32, %arg1: i32) -> (i32, i32) {
    %c0_i32 = arith.constant 0 : i32
    %c0_i32_0 = arith.constant 0 : i32
    %c0_i32_1 = arith.constant 0 : i32
    return %c0_i32, %c0_i32_0 : i32, i32
  }
  func.func @transform_15(%arg0: i32, %arg1: i32) -> (i32, i32) {
    %c0_i32 = arith.constant 0 : i32
    %c0_i32_0 = arith.constant 0 : i32
    %c0_i32_1 = arith.constant 0 : i32
    return %c0_i32, %c0_i32_0 : i32, i32
  }
  func.func @transform_16(%arg0: i32, %arg1: i32) -> (i32, i32) {
    %c0_i32 = arith.constant 0 : i32
    %c0_i32_0 = arith.constant 0 : i32
    %c0_i32_1 = arith.constant 0 : i32
    return %c0_i32, %c0_i32_0 : i32, i32
  }
  func.func @transform_17(%arg0: i32, %arg1: i32) -> (i32, i32) {
    %c0_i32 = arith.constant 0 : i32
    %c0_i32_0 = arith.constant 0 : i32
    %c0_i32_1 = arith.constant 0 : i32
    return %c0_i32, %c0_i32_0 : i32, i32
  }
  func.func @transform_18(%arg0: i32, %arg1: i32) -> (i32, i32) {
    %c0_i32 = arith.constant 0 : i32
    %c0_i32_0 = arith.constant 0 : i32
    %c0_i32_1 = arith.constant 0 : i32
    return %c0_i32, %c0_i32_0 : i32, i32
  }
  func.func @transform_19(%arg0: i32, %arg1: i32) -> (i32, i32) {
    %c0_i32 = arith.constant 0 : i32
    %c0_i32_0 = arith.constant 0 : i32
    %c0_i32_1 = arith.constant 0 : i32
    return %c0_i32, %c0_i32_0 : i32, i32
  }
  func.func @transform_20(%arg0: i32, %arg1: i32) -> (i32, i32) {
    %c0_i32 = arith.constant 0 : i32
    %c0_i32_0 = arith.constant 0 : i32
    %c0_i32_1 = arith.constant 0 : i32
    return %c0_i32, %c0_i32_0 : i32, i32
  }
  func.func @transform_21(%arg0: i32, %arg1: i32) -> (i32, i32, i32) {
    %c0_i32 = arith.constant 0 : i32
    %c0_i32_0 = arith.constant 0 : i32
    %c0_i32_1 = arith.constant 0 : i32
    return %arg0, %c0_i32, %c0_i32_0 : i32, i32, i32
  }
}

</mosaic_0001>

<bundles_post_ra>
// kernel: tpu_custom_call.1
= control target key start
LH: loop header
LB: loop body
LE: loop exit
PB: predicated region body
PF: predicated region fallthrough
CT: control target
= control target key end

     0   :  { %s1745_s0 = inlined_call_operand.vmem [shape: bf16[2,16,32], index: 0, kind: input, shape index: {}]   ;;  %s1746_s1 = inlined_call_operand.vmem [shape: f32[2,1,10], index: 1, kind: input, shape index: {}]   ;;  %s1747_s2 = inlined_call_operand.vmem [shape: bf16[32,32], index: 2, kind: input, shape index: {}]   ;;  %s1748_s3 = inlined_call_operand.hbm [shape: f32[1,32], index: 3, kind: input, shape index: {}]   ;;  %s1749_s4 = inlined_call_operand.vmem [shape: bf16[32,16], index: 4, kind: input, shape index: {}]   ;;  %s1750_s5 = inlined_call_operand.hbm [shape: f32[1,16], index: 5, kind: input, shape index: {}]   ;;  %s1751_s6 = inlined_call_operand.vmem [shape: bf16[16,128], index: 6, kind: input, shape index: {}]   ;;  %s1752_s7 = inlined_call_operand.vmem [shape: f32[1,128], index: 7, kind: input, shape index: {}]   ;;  %s1753_s8 = inlined_call_operand.vmem [shape: bf16[10,10], index: 8, kind: input, shape index: {}]   ;;  %s1754_s9 = inlined_call_operand.vmem [shape: f32[1,10], index: 9, kind: input, shape index: {}]   ;;  %s1755_s10 = inlined_call_operand.vmem [shape: bf16[10,5], index: 10, kind: input, shape index: {}]   ;;  %s1756_s11 = inlined_call_operand.vmem [shape: f32[1,5], index: 11, kind: input, shape index: {}]   ;;  %s1757_s12 = inlined_call_operand.vmem [shape: bf16[5,128], index: 12, kind: input, shape index: {}]   ;;  %s1758_s13 = inlined_call_operand.vmem [shape: f32[1,128], index: 13, kind: input, shape index: {}]   ;;  %s1759_s14 = inlined_call_operand.vmem [shape: bf16[32,21], index: 14, kind: input, shape index: {}]   ;;  %s1760_s15 = inlined_call_operand.vmem [shape: bf16[10,21], index: 15, kind: input, shape index: {}]   ;;  %s1761_s16 = inlined_call_operand.vmem [shape: f32[1,21], index: 16, kind: input, shape index: {}]   ;;  %s1762_s17 = inlined_call_operand.vmem [shape: bf16[21,10], index: 17, kind: input, shape index: {}]   ;;  %s1763_s18 = inlined_call_operand.vmem [shape: f32[1,10], index: 18, kind: input, shape index: {}]   ;;  %s1764_s19 = inlined_call_operand.vmem [shape: bf16[10,128], index: 19, kind: input, shape index: {}]   ;;  %s1765_s20 = inlined_call_operand.vmem [shape: f32[1,128], index: 20, kind: input, shape index: {}]   ;;  %s1766_s21 = inlined_call_operand.hbm [shape: f32[2,8,128], index: 21, kind: output, shape index: {}]  }
   0x1   :  { %1773 = sst [smem:[#allocation12_spill]] %s1745_s0 }
   0x2   :  { %1774 = sst [smem:[#allocation13_spill]] %s1746_s1 }
   0x3   :  { %1775 = sst [smem:[#allocation14_spill]] %s1747_s2 }
   0x4   :  { %1776 = sst [smem:[#allocation15_spill]] %s1748_s3 }
   0x5   :  { %1777 = sst [smem:[#allocation16_spill]] %s1749_s4 }
   0x6   :  { %1778 = sst [smem:[#allocation17_spill]] %s1750_s5 }
   0x7   :  { %26 = vsyncpa [#allocation4], 0 }
   0x8   :  { %27 = vsyncpa [#allocation7], 0 }
   0x9   :  { %28 = vsyncpa [#allocation5], 0  ;;  %s1384_s2 = smov [#allocation3]   ;;  %s1385_s26 = smov [#allocation6]  }
   0xa   :  { %s41_s25 = sshll.u32 %s1384_s2, 4  ;;  %s53_s27 = sshll.u32 %s1385_s26, 4  ;;  %s42_s25 = int_to_ptr.vmem [resolvable:$true] %s41_s25  ;;  %s54_s27 = int_to_ptr.vmem [resolvable:$true] %s53_s27 }
   0xb   :  { %s1779_s29 = sld [smem:[#allocation15_spill]] }
  0x11   :  { %s1312_s0 = scalar_lea.hbm %s1779_s29, 16 }
  0x12   :  { %p1313_p0 = scmp.ne.s32.totalorder %s1779_s29, %s1312_s0  ;;  %p1316_p1 = scmp.lt.u32.totalorder %s1312_s0, %s1779_s29 }
  0x14   :  { %p1318_p2 = pnand %p1316_p1, %p1313_p0 }
  0x16   :  { %1321 = shalt.err (!%p1318_p2)
}
  0x17   :  { %s1322_s23 = scalar_lea.vmem %s42_s25, 16  ;;  %s1326_s1 = scalar_lea.vmem %s42_s25, 32 }
  0x18   :  { %p1323_p3 = scmp.ne.s32.totalorder %s42_s25, %s1322_s23  ;;  %p1327_p4 = scmp.lt.s32.totalorder %s42_s25, %s42_s25 }
  0x19   :  { %p1328_p5 = scmp.lt.s32.totalorder %s1326_s1, %s1322_s23 }
  0x1b   :  { %p1329_p6 = por %p1328_p5, %p1327_p4 }
  0x1d   :  { %p1330_p7 = pnand %p1329_p6, %p1323_p3 }
  0x1f   :  { %1333 = shalt.err (!%p1330_p7)
}
  0x20   :  { %44 = dma.hbm_to_vmem [thread:$0]  %s1779_s29, 16, %s42_s25, [#allocation4]  }
  0x21   :  { %s1780_s28 = sld [smem:[#allocation17_spill]] }
  0x27   :  { %s1334_s4 = scalar_lea.hbm %s1780_s28, 16 }
  0x28   :  { %p1335_p8 = scmp.ne.s32.totalorder %s1780_s28, %s1334_s4  ;;  %p1338_p9 = scmp.lt.u32.totalorder %s1334_s4, %s1780_s28 }
  0x2a   :  { %p1340_p10 = pnand %p1338_p9, %p1335_p8 }
  0x2c   :  { %1343 = shalt.err (!%p1340_p10)
}
  0x2d   :  { %s1344_s23 = scalar_lea.vmem %s54_s27, 16  ;;  %s1348_s1 = scalar_lea.vmem %s54_s27, 32 }
  0x2e   :  { %p1345_p11 = scmp.ne.s32.totalorder %s54_s27, %s1344_s23  ;;  %p1349_p12 = scmp.lt.s32.totalorder %s54_s27, %s54_s27 }
  0x2f   :  { %p1350_p13 = scmp.lt.s32.totalorder %s1348_s1, %s1344_s23 }
  0x31   :  { %p1351_p0 = por %p1350_p13, %p1349_p12 }
  0x33   :  { %p1352_p1 = pnand %p1351_p0, %p1345_p11 }
  0x35   :  { %1355 = shalt.err (!%p1352_p1)
}
  0x36   :  { %56 = dma.hbm_to_vmem [thread:$0]  %s1780_s28, 16, %s54_s27, [#allocation7]  }
  0x37   :  { %1378 = dma.done.wait [#allocation4], 16  }
  0x38   :  { %1379 = vsyncadd [#allocation4], 4294967280 }
  0x39   :  { %1380 = dma.done.wait [#allocation7], 16  }
  0x3a   :  { %1381 = vsyncadd [#allocation7], 4294967280  ;;  %vm98_vm0 = vcmask 254976   ;;  %v1386_v0 = vmov 0.0   ;;  %vm1387_vm1 = vmmov 0   ;;  %s1781_s2 = sld [smem:[#allocation14_spill]] }
  0x3b   :  { %1188 = vmatprep.subr.bf16.mxu0 %v1386_v0  ;;  %1078 = vst [vmem:[#allocation8 + $0x5] sm:$0x1] %v1386_v0  ;;  %1079 = vst [vmem:[#allocation8 + $0xd] sm:$0x1] %v1386_v0  ;;  %1192 = vmatprep.mubr.msk.bf16.mxu0 %vm1387_vm1, %v1386_v0  ;;  %s1782_s30 = sld [smem:[#allocation12_spill]]  ;;  %vm109_vm2 = vcmask 261120  }
  0x3c   :  { %1080 = vst [vmem:[#allocation8 + $0x6] sm:$0x1] %v1386_v0  ;;  %1081 = vst [vmem:[#allocation8 + $0xe] sm:$0x1] %v1386_v0  ;;  %1196 = vmatprep.subr.bf16.mxu1 %v1386_v0  ;;  %1200 = vmatprep.mubr.msk.bf16.mxu1 %vm1387_vm1, %v1386_v0  ;;  %s1783_s1 = sld [smem:[#allocation16_spill]]  ;;  %vm130_vm3 = vcmask 1041409  }
  0x3d   :  { %1082 = vst [vmem:[#allocation8 + $0x7] sm:$0x1] %v1386_v0  ;;  %1083 = vst [vmem:[#allocation8 + $0xf] sm:$0x1] %v1386_v0  ;;  %v1587_v35 = vld [vmem:[%s1751_s6] sm:$0xff]   ;;  %s1784_s3 = sld [smem:[#allocation13_spill]] }
  0x3e   :  { %99 = vst.msk [vmem:[#allocation2] sm:$0x3] %vm98_vm0, %v1386_v0  ;;  %v1597_v39 = vld [vmem:[#allocation3] ss:$0 sm:$0xff]  ;;  %vm365_vm4 = vcmask 1044480   ;;  %vm361_vm5 = vcmask 80896  }
  0x3f   :  { %v1291_v42 = vld [vmem:[%s1753_s8] sm:$0x1f]   ;;  %vm292_vm6 = vcmask 130048   ;;  %vm484_vm7 = vcmask 1041408   ;;  %vm485_vm8 = vcmask 1042432   ;;  %vm480_vm9 = vcmask 39936  }
  0x40   :  { %v1544_v1 = vld [vmem:[%s1781_s2] sm:$0xff]   ;;  %v1550_v2 = vld [vmem:[%s1781_s2 + $0x8] sm:$0xff]   ;;  %v367_v51 = vsel %vm365_vm4, %v1291_v42, 0  ;;  %vm666_vm10 = vcmask 171008  }
  0x41   :  { %1189 = vmatpush3.bf16.msra.mxu0 %v1544_v1  ;;  %v1148_v3 = vld [vmem:[%s1782_s30] sm:$0xff]   ;;  %v1155_v4 = vld [vmem:[%s1782_s30 + $0x8] sm:$0xff]  }
  0x42   :  { %1190 = vmatprep.subr.bf16.mxu0 %v1386_v0  ;;  %v1149_v5 = vunpack.c.l.bf16 %v1148_v3  ;;  %v1150_v6 = vunpack.c.h.bf16 %v1148_v3  ;;  %v1153_v7 = vunpack.c.l.bf16 %v1155_v4  ;;  %v1154_v8 = vunpack.c.h.bf16 %v1155_v4  ;;  %v1562_v9 = vld [vmem:[%s1783_s1] sm:$0xff]   ;;  %v1580_v34 = vld [vmem:[%s1783_s1 + $0x8] sm:$0xff]  }
  0x43   :  { %1197 = vmatpush3.bf16.msra.mxu1 %v1562_v9  ;;  %v337_v36 = vld [vmem:[%s1784_s3 + $0x1] sm:$0x1]  ;;  %v336_v38 = vld [vmem:[%s1784_s3] sm:$0x1]  ;;  %v1615_v54 = vld [vmem:[#allocation6] ss:$0 sm:$0xff] }
  0x44   :  { %v110_v10 = vsel %vm109_vm2, %v1149_v5, 0.0  ;;  %v111_v11 = vsel %vm109_vm2, %v1150_v6, 0.0  ;;  %v119_v12 = vsel %vm109_vm2, %v1153_v7, 0.0  ;;  %v120_v13 = vsel %vm109_vm2, %v1154_v8, 0.0  ;;  %1198 = vmatprep.subr.bf16.mxu1 %v1386_v0  ;;  %v1293_v58 = vld [vmem:[%s1755_s10] sm:$0x1f]  }
  0x45   :  { %1191 = vmatpush3.bf16.msra.mxu0 %v1550_v2  ;;  %v112_v14 = vadd.f32 %v111_v11, %v110_v10  ;;  %v121_v15 = vadd.f32 %v120_v13, %v119_v12  ;;  %v108_v26 = vld [vmem:[#allocation2] sm:$0x3]  ;;  %v339_v37 = vpack.c.bf16 %v337_v36, %v337_v36  ;;  %v338_v40 = vpack.c.bf16 %v336_v38, %v336_v38 }
  0x46   :  { %1204 = vmatprep.subr.bf16.mxu0 %v1386_v0  ;;  %v428_v63 = vsel %vm365_vm4, %v1293_v58, 0  ;;  %v1113_v3 = vld [vmem:[%s1754_s9] ss:$0 sm:$0xff] }
  0x47   :  { %v113_v16 = vrot.slane %v112_v14, 4  ;;  %v122_v17 = vrot.slane %v121_v15, 4  ;;  %1199 = vmatpush3.bf16.msra.mxu1 %v1580_v34  ;;  %v352_v41 = vunpack.c.l.b16 %v339_v37  ;;  %v351_v47 = vunpack.c.l.b16 %v338_v40  ;;  %v1294_v7 = vld [vmem:[%s1760_s15] sm:$0x1f]  }
  0x48   :  { %1210 = vmatprep.subr.bf16.mxu1 %v1386_v0  ;;  %v543_v12 = vsel %vm365_vm4, %v1294_v7, 0  ;;  %v472_v13 = vld [vmem:[%s1757_s12] sm:$0x7] }
  0x49   :  { %v114_v18 = vadd.f32 %v113_v16, %v112_v14  ;;  %v123_v19 = vadd.f32 %v122_v17, %v121_v15  ;;  %v353_v48 = vrot.slane %v352_v41, 7  ;;  %v1388_v14 = vmov 65535   ;;  %v1295_v42 = vld [vmem:[%s1759_s14] sm:$0xff]  }
  0x4a   :  { %v486_v15 = vsel %vm484_vm7, 4294967295, %v1388_v14 }
  0x4b   :  { %v115_v20 = vrot.slane %v114_v18, 2  ;;  %v124_v21 = vrot.slane %v123_v19, 2  ;;  %v354_v52 = vsel %vm130_vm3, %v353_v48, %v351_v47  ;;  %v487_v16 = vsel %vm485_vm8, %v486_v15, 0 }
  0x4c   :  { %v355_v53 = vpack.c.b16 %v354_v52, %v354_v52  ;;  %v489_v17 = vand.u32 %v487_v16, %v472_v13 }
  0x4d   :  { %v116_v22 = vadd.f32 %v115_v20, %v114_v18  ;;  %v125_v23 = vadd.f32 %v124_v21, %v123_v19  ;;  %v1389_v18 = vmov 1966171168   ;;  %v947_v20 = vlaneseq }
  0x4e   :  { %v945_v19 = vunpack.c.l.s4 %v1389_v18 }
  0x4f   :  { %v117_v24 = vrot.slane %v116_v22, 1  ;;  %v126_v25 = vrot.slane %v125_v23, 1 }
  0x50   :  { %v946_v21 = vunpack.c.0.s8 %v945_v19 }
  0x51   :  { %v118_v27 = vadd.f32 %v117_v24, %v116_v22  ;;  %v127_v28 = vadd.f32 %v126_v25, %v125_v23  ;;  %v948_v22 = vshrl.u32 %v947_v20, 7  ;;  %v1648_v23 = vld [vmem:[%s1752_s7] ss:$0 sm:$0xff] }
  0x53   :  { %v131_v29 = vsel %vm130_vm3, %v127_v28, %v118_v27  ;;  %v1650_v24 = vsub.s32 %v946_v21, %v948_v22 }
  0x54   :  { %v133_v30 = vadd.f32 %v131_v29, %v108_v26 }
  0x56   :  { %135 = vst.msk [vmem:[#allocation2] sm:$0x3] %vm98_vm0, %v133_v30 }
  0x5d   :  { %v139_v31 = vld [vmem:[#allocation2] sm:$0x3] }
  0x5e   :  { %v140_v32 = vmul.f32 0.0625, %v139_v31 }
  0x60   :  { %v141_v33 = vpack.c.bf16 %v140_v32, %v140_v32  ;;  %v1116_v32 = vld [vmem:[%s1756_s11] ss:$0 sm:$0xff] }
  0x62   :  { %1193 = vmatmul.mubr.msk.bf16.vlgmr.msra.gmra.mrb[0].mxu0 %vm109_vm2, %v141_v33 }
  0x63   :  { %1206 = vmatprep.mubr.msk.bf16.mxu0 %vm1387_vm1, %v1386_v0  ;;  %1205 = vmatpush3.bf16.msra.mxu0 %v1587_v35 }
  0x64   :  { %1216 = vmatprep.subr.bf16.mxu0 %v1386_v0 }
 0x135   :  { %v202_v43 = vpop.f32.mrb[0].mxu0 }
 0x136   :  { %v203_v44 = vadd.f32 %v1597_v39, %v202_v43  ;;  %v1194_v45 = vpop.f32.mrb[1].mxu0 }
 0x137   :  { %v205_v46 = vpop.f32.mrb[2].mxu0  ;;  %v1296_v45 = vld [vmem:[%s1759_s14 + $0x8] sm:$0xff]  }
 0x138   :  { %v1603_v49 = vpack.c.bf16 %v203_v44, %v203_v44  ;;  %v1195_v50 = vpop.f32.mrb[3].mxu0 }
 0x139   :  { %v1297_v50 = vld [vmem:[%s1762_s17] sm:$0xff]  }
 0x13a   :  { %1201 = vmatmul.mubr.msk.bf16.vlgmr.msra.gmra.mrb[0].mxu1 %vm109_vm2, %v1603_v49 }
 0x13b   :  { %1211 = vmatpush3.bf16.msra.mxu1 %v367_v51  ;;  %1212 = vmatprep.mubr.msk.bf16.mxu1 %vm1387_vm1, %v1386_v0  ;;  %v1298_v51 = vld [vmem:[%s1762_s17 + $0x8] ss:$0 sps:$4 sm:$0x77]  }
 0x13c   :  { %1222 = vmatprep.subr.bf16.mxu1 %v1386_v0  ;;  %v671_v52 = vand.u32 %v1298_v51, %v487_v16 }
 0x142   :  { %1213 = vmatmul.mubr.msk.bf16.vlgmr.msra.gmra.mrb[4].mxu1 %vm361_vm5, %v355_v53  ;;  %v1119_v53 = vld [vmem:[%s1758_s13] ss:$0 sm:$0xff] }
 0x143   :  { %1224 = vmatprep.mubr.msk.bf16.mxu1 %vm1387_vm1, %v1386_v0  ;;  %1223 = vmatpush3.bf16.msra.mxu1 %v489_v17 }
 0x144   :  { %1234 = vmatprep.subr.bf16.mxu1 %v1386_v0 }
 0x20d   :  { %v269_v55 = vpop.f32.mrb[0].mxu1 }
 0x20e   :  { %v270_v56 = vadd.f32 %v1615_v54, %v269_v55  ;;  %v1202_v57 = vpop.f32.mrb[1].mxu1 }
 0x20f   :  { %v272_v59 = vpop.f32.mrb[2].mxu1 }
 0x210   :  { %v275_v60 = vmax.f32 %v270_v56, 0.0  ;;  %v1203_v61 = vpop.f32.mrb[3].mxu1 }
 0x212   :  { %v276_v62 = vpack.c.bf16 %v275_v60, %v275_v60 }
 0x214   :  { %1207 = vmatmul.mubr.msk.bf16.vlgmr.msra.gmra.mrb[4].mxu0 %vm292_vm6, %v276_v62 }
 0x215   :  { %1217 = vmatpush3.bf16.msra.mxu0 %v428_v63  ;;  %v403_v4 = vpop.f32.mrb[4].mxu1  ;;  %1218 = vmatprep.mubr.msk.bf16.mxu0 %vm1387_vm1, %v1386_v0 }
 0x216   :  { %v404_v5 = vadd.f32 %v1113_v3, %v403_v4  ;;  %v1214_v6 = vpop.f32.mrb[5].mxu1  ;;  %1228 = vmatprep.subr.bf16.mxu0 %v1386_v0  ;;  %v1126_v3 = vld [vmem:[%s1761_s16] ss:$0 sm:$0xff] }
 0x217   :  { %v406_v8 = vpop.f32.mrb[6].mxu1 }
 0x218   :  { %v409_v10 = vpack.c.bf16 %v404_v5, %v404_v5  ;;  %v1215_v11 = vpop.f32.mrb[7].mxu1 }
 0x21c   :  { %1219 = vmatmul.mubr.msk.bf16.vlgmr.msra.gmra.mrb[8].mxu0 %vm361_vm5, %v409_v10 }
 0x21d   :  { %1229 = vmatpush3.bf16.msra.mxu0 %v543_v12  ;;  %1230 = vmatprep.mubr.msk.bf16.mxu0 %vm1387_vm1, %v1386_v0  ;;  %v1299_v12 = vld [vmem:[%s1764_s19] sm:$0x1f]  }
 0x21e   :  { %1242 = vmatprep.subr.bf16.mxu0 %v1386_v0  ;;  %v732_v13 = vsel %vm365_vm4, %v1299_v12, 0 }
 0x224   :  { %1231 = vmatmul.mubr.msk.bf16.vlgmr.msra.gmra.mrb[12].mxu0 %vm361_vm5, %v409_v10 }
 0x225   :  { %1246 = vmatprep.mubr.msk.bf16.mxu0 %vm1387_vm1, %v1386_v0  ;;  %1243 = vmatpush3.bf16.msra.mxu0 %v1297_v50 }
 0x226   :  { %1244 = vmatprep.subr.bf16.mxu0 %v1386_v0 }
 0x229   :  { %1245 = vmatpush3.bf16.msra.mxu0 %v671_v52 }
 0x22a   :  { %1256 = vmatprep.subr.bf16.mxu0 %v1386_v0 }
 0x2e7   :  { %v330_v25 = vpop.f32.mrb[4].mxu0 }
 0x2e8   :  { %v331_v26 = vadd.f32 %v1648_v23, %v330_v25  ;;  %v1208_v27 = vpop.f32.mrb[5].mxu0 }
 0x2e9   :  { %v333_v28 = vpop.f32.mrb[6].mxu0 }
 0x2ea   :  { %v1058_v29 = vrot.slane %v331_v26, %v1650_v24  ;;  %v1209_v30 = vpop.f32.mrb[7].mxu0 }
 0x2ec   :  { %v1059_v31 = vcombine.high %v1058_v29, %v1058_v29  ;;  %1145 = vst.sshfl [vmem:[#allocation8 + $0x4] sm:$0x1 pattern:$0x73625140] %v1058_v29 }
 0x2ee   :  { %1146 = vst.sshfl [vmem:[#allocation8 + $0xc] sm:$0x1 pattern:$0x73625140] %v1059_v31 }
 0x2ef   :  { %v464_v33 = vpop.f32.mrb[8].mxu0 }
 0x2f0   :  { %v465_v36 = vadd.f32 %v1116_v32, %v464_v33  ;;  %v1220_v37 = vpop.f32.mrb[9].mxu0 }
 0x2f1   :  { %v467_v38 = vpop.f32.mrb[10].mxu0 }
 0x2f2   :  { %v470_v40 = vmax.f32 %v465_v36, 0.0  ;;  %v1221_v41 = vpop.f32.mrb[11].mxu0 }
 0x2f4   :  { %v471_v43 = vpack.c.bf16 %v470_v40, %v470_v40 }
 0x2f6   :  { %1225 = vmatmul.mubr.msk.bf16.vlgmr.msra.gmra.mrb[8].mxu1 %vm480_vm9, %v471_v43 }
 0x2f7   :  { %1235 = vmatpush3.bf16.msra.mxu1 %v1295_v42  ;;  %v579_v44 = vpop.f32.mrb[12].mxu0  ;;  %1238 = vmatprep.mubr.msk.bf16.mxu1 %vm1387_vm1, %v1386_v0 }
 0x2f8   :  { %v1232_v46 = vpop.f32.mrb[13].mxu0  ;;  %1236 = vmatprep.subr.bf16.mxu1 %v1386_v0 }
 0x2f9   :  { %v582_v47 = vpop.f32.mrb[14].mxu0 }
 0x2fa   :  { %v1233_v48 = vpop.f32.mrb[15].mxu0 }
 0x2fb   :  { %1237 = vmatpush3.bf16.msra.mxu1 %v1296_v45 }
 0x2fc   :  { %1250 = vmatprep.subr.bf16.mxu1 %v1386_v0 }
 0x2fe   :  { %1239 = vmatmul.mubr.msk.bf16.vlgmr.msra.gmra.mrb[12].mxu1 %vm109_vm2, %v1603_v49 }
 0x2ff   :  { %1252 = vmatprep.mubr.msk.bf16.mxu1 %vm1387_vm1, %v1386_v0  ;;  %1251 = vmatpush3.bf16.msra.mxu1 %v732_v13 }
 0x300   :  { %1264 = vmatprep.subr.bf16.mxu1 %v1386_v0 }
 0x3c9   :  { %v525_v55 = vpop.f32.mrb[8].mxu1 }
 0x3ca   :  { %v1682_v56 = vadd.f32 %v1119_v53, %v525_v55  ;;  %v1226_v57 = vpop.f32.mrb[9].mxu1 }
 0x3cb   :  { %v528_v58 = vpop.f32.mrb[10].mxu1 }
 0x3cc   :  { %v1031_v59 = vrot.slane %v1682_v56, %v1650_v24  ;;  %v1227_v60 = vpop.f32.mrb[11].mxu1  ;;  %v929_v61 = vsel %vm484_vm7, %v1682_v56, -inf }
 0x3cd   :  { %930 = vmax.xlane.f32.xlu1 %v929_v61 }
 0x3ce   :  { %v1032_v62 = vcombine.high %v1031_v59, %v1031_v59  ;;  %1143 = vst.sshfl [vmem:[#allocation8 + $0x3] sm:$0x1 pattern:$0x73625140] %v1031_v59 }
 0x3d0   :  { %1144 = vst.sshfl [vmem:[#allocation8 + $0xb] sm:$0x1 pattern:$0x73625140] %v1032_v62 }
 0x3d1   :  { %v631_v63 = vpop.f32.mrb[12].mxu1 }
 0x3d2   :  { %v632_v4 = vadd.f32 %v631_v63, %v579_v44  ;;  %v1240_v5 = vpop.f32.mrb[13].mxu1 }
 0x3d3   :  { %v634_v6 = vpop.f32.mrb[14].mxu1 }
 0x3d4   :  { %v644_v7 = vadd.f32 %v1126_v3, %v632_v4  ;;  %v1241_v8 = vpop.f32.mrb[15].mxu1 }
 0x3d6   :  { %v645_v10 = vmax.f32 %v644_v7, 0.0 }
 0x3d8   :  { %v646_v11 = vpack.c.bf16 %v645_v10, %v645_v10 }
 0x3da   :  { %1247 = vmatmul.mubr.msk.bf16.vlgmr.msra.gmra.mrb[16].mxu0 %vm666_vm10, %v646_v11 }
 0x3db   :  { %1257 = vmatpush3.bf16.msra.mxu0 %v1544_v1  ;;  %1260 = vmatprep.mubr.msk.bf16.mxu0 %vm1387_vm1, %v1386_v0  ;;  %v1127_v1 = vld [vmem:[%s1763_s18] ss:$0 sm:$0xff] }
 0x3dc   :  { %1258 = vmatprep.subr.bf16.mxu0 %v1386_v0 }
 0x3df   :  { %1259 = vmatpush3.bf16.msra.mxu0 %v1550_v2 }
 0x3e0   :  { %1272 = vmatprep.subr.bf16.mxu0 %v1386_v0 }
 0x3e2   :  { %1261 = vmatmul.mubr.msk.bf16.vlgmr.msra.gmra.mrb[20].mxu0 %vm109_vm2, %v1603_v49 }
 0x3e3   :  { %1273 = vmatpush3.bf16.msra.mxu0 %v1587_v35  ;;  %1274 = vmatprep.mubr.msk.bf16.mxu0 %vm1387_vm1, %v1386_v0 }
 0x45a   :  { %v931_v47 = vpop.xlane.xlu1 %930 }
 0x45b   :  { %v932_v48 = vsub.f32 %v1682_v56, %v931_v47 }
 0x4ad   :  { %v707_v2 = vpop.f32.mrb[16].mxu0 }
 0x4ae   :  { %v708_v14 = vadd.f32 %v1127_v1, %v707_v2  ;;  %v1248_v15 = vpop.f32.mrb[17].mxu0 }
 0x4af   :  { %v710_v16 = vpop.f32.mrb[18].mxu0 }
 0x4b0   :  { %v713_v17 = vpack.c.bf16 %v708_v14, %v708_v14  ;;  %v1249_v18 = vpop.f32.mrb[19].mxu0 }
 0x4b2   :  { %1253 = vmatmul.mubr.msk.bf16.vlgmr.msra.gmra.mrb[16].mxu1 %vm361_vm5, %v713_v17 }
 0x4b3   :  { %1265 = vmatpush3.bf16.msra.mxu1 %v1562_v9  ;;  %1268 = vmatprep.mubr.msk.bf16.mxu1 %vm1387_vm1, %v1386_v0  ;;  %v1131_v9 = vld [vmem:[%s1765_s20] ss:$0 sm:$0xff]  ;;  %s1390_s20 = smov [#allocation8]  }
 0x4b4   :  { %1266 = vmatprep.subr.bf16.mxu1 %v1386_v0  ;;  %s1089_s0 = sshll.u32 %s1390_s20, 4  ;;  %s1090_s0 = int_to_ptr.vmem [resolvable:$true] %s1089_s0 }
 0x4b5   :  { %v808_v35 = vpop.f32.mrb[20].mxu0  ;;  %s1356_s5 = scalar_lea.vmem %s1090_s0, 256  ;;  %p1361_p3 = scmp.lt.s32.totalorder %s1090_s0, %s1090_s0 }
 0x4b6   :  { %v809_v49 = vadd.f32 %v1597_v39, %v808_v35  ;;  %v1262_v19 = vpop.f32.mrb[21].mxu0  ;;  %p1357_p2 = scmp.ne.s32.totalorder %s1090_s0, %s1356_s5  ;;  %p1362_p4 = scmp.lt.s32.totalorder %s1356_s5, %s1356_s5 }
 0x4b7   :  { %1267 = vmatpush3.bf16.msra.mxu1 %v1580_v34  ;;  %v811_v20 = vpop.f32.mrb[22].mxu0 }
 0x4b8   :  { %v814_v21 = vpack.c.bf16 %v809_v49, %v809_v49  ;;  %v1263_v22 = vpop.f32.mrb[23].mxu0  ;;  %p1363_p5 = por %p1362_p4, %p1361_p3 }
 0x4ba   :  { %1269 = vmatmul.mubr.msk.bf16.vlgmr.msra.gmra.mrb[20].mxu1 %vm109_vm2, %v814_v21  ;;  %p1364_p6 = pnand %p1363_p5, %p1357_p2 }
 0x585   :  { %v768_v25 = vpop.f32.mrb[16].mxu1 }
 0x586   :  { %v769_v26 = vadd.f32 %v1131_v9, %v768_v25  ;;  %v1254_v27 = vpop.f32.mrb[17].mxu1 }
 0x587   :  { %v771_v28 = vpop.f32.mrb[18].mxu1 }
 0x588   :  { %v977_v0 = vrot.slane %v769_v26, %v1650_v24  ;;  %v1255_v29 = vpop.f32.mrb[19].mxu1 }
 0x58a   :  { %v978_v39 = vcombine.high %v977_v0, %v977_v0  ;;  %1139 = vst.sshfl [vmem:[#allocation8 + $0x1] sm:$0x1 pattern:$0x73625140] %v977_v0 }
 0x58c   :  { %1140 = vst.sshfl [vmem:[#allocation8 + $0x9] sm:$0x1 pattern:$0x73625140] %v978_v39 }
 0x58d   :  { %v852_v34 = vpop.f32.mrb[20].mxu1 }
 0x58e   :  { %v853_v30 = vadd.f32 %v1615_v54, %v852_v34  ;;  %v1270_v31 = vpop.f32.mrb[21].mxu1  ;;  %v903_v54 = vsel %vm484_vm7, %v769_v26, -inf }
 0x58f   :  { %v855_v32 = vpop.f32.mrb[22].mxu1 }
 0x590   :  { %v858_v33 = vmax.f32 %v853_v30, 0.0  ;;  %v1271_v36 = vpop.f32.mrb[23].mxu1 }
 0x592   :  { %v859_v37 = vpack.c.bf16 %v858_v33, %v858_v33 }
 0x594   :  { %1275 = vmatmul.mubr.msk.bf16.vlgmr.msra.gmra.mrb[24].mxu0 %vm292_vm6, %v859_v37 }
 0x667   :  { %v897_v38 = vpop.f32.mrb[24].mxu0 }
 0x668   :  { %v898_v40 = vadd.f32 %v1648_v23, %v897_v38  ;;  %v1276_v41 = vpop.f32.mrb[25].mxu0  ;;  %v933_v23 = vmul.f32 1.442695, %v932_v48 }
 0x669   :  { %v900_v42 = vpop.f32.mrb[26].mxu0 }
 0x66a   :  { %v1004_v43 = vrot.slane %v898_v40, %v1650_v24  ;;  %v1277_v44 = vpop.f32.mrb[27].mxu0  ;;  %v915_v45 = vsel %vm484_vm7, %v898_v40, -inf }
 0x66b   :  { %916 = vmax.xlane.f32.xlu0 %v915_v45 }
 0x66c   :  { %v1005_v46 = vcombine.high %v1004_v43, %v1004_v43  ;;  %1141 = vst.sshfl [vmem:[#allocation8 + $0x2] sm:$0x1 pattern:$0x73625140] %v1004_v43 }
 0x66e   :  { %1142 = vst.sshfl [vmem:[#allocation8 + $0xa] sm:$0x1 pattern:$0x73625140] %v1005_v46 }
 0x66f   :  { %904 = vmax.xlane.f32.xlu0 %v903_v54 }
 0x6f8   :  { %v917_v50 = vpop.xlane.xlu0 %916 }
 0x6f9   :  { %v918_v51 = vsub.f32 %v898_v40, %v917_v50 }
 0x6fb   :  { %v919_v52 = vmul.f32 1.442695, %v918_v51 }
 0x6fc   :  { %v905_v53 = vpop.xlane.xlu0 %904 }
 0x6fd   :  { %1300 = vpow2.f32 %v919_v52  ;;  %v906_v55 = vsub.f32 %v769_v26, %v905_v53 }
 0x6fe   :  { %1302 = vpow2.f32 %v933_v23 }
 0x6ff   :  { %v907_v57 = vmul.f32 1.442695, %v906_v55 }
 0x701   :  { %1304 = vpow2.f32 %v907_v57 }
 0x707   :  { %v1301_v58 = vpop.eup %1300 }
 0x708   :  { %v921_v59 = vsel %vm484_vm7, %v1301_v58, 0.0  ;;  %v1303_v60 = vpop.eup %1302 }
 0x709   :  { %922 = vadd.xlane.f32.xlu1 %v921_v59  ;;  %v935_v62 = vsel %vm484_vm7, %v1303_v60, 0.0 }
 0x70b   :  { %v1305_v61 = vpop.eup %1304 }
 0x70c   :  { %v909_v56 = vsel %vm484_vm7, %v1305_v61, 0.0 }
 0x70d   :  { %936 = vadd.xlane.f32.xlu1 %v935_v62  ;;  %910 = vadd.xlane.f32.xlu0 %v909_v56 }
 0x796   :  { %v923_v63 = vpop.xlane.xlu1 %922 }
 0x797   :  { %1306 = vlog2.f32 %v923_v63 }
 0x79a   :  { %v937_v3 = vpop.xlane.xlu1 %936  ;;  %v911_v4 = vpop.xlane.xlu0 %910 }
 0x79b   :  { %1308 = vlog2.f32 %v937_v3 }
 0x79c   :  { %1310 = vlog2.f32 %v911_v4 }
 0x7a1   :  { %v1307_v5 = vpop.eup %1306 }
 0x7a2   :  { %v925_v6 = vmul.f32 0.6931472, %v1307_v5 }
 0x7a4   :  { %v926_v8 = vsub.f32 %v918_v51, %v925_v6 }
 0x7a5   :  { %v1309_v7 = vpop.eup %1308 }
 0x7a6   :  { %v1311_v10 = vpop.eup %1310  ;;  %v939_v11 = vmul.f32 0.6931472, %v1309_v7  ;;  %v927_v1 = vmul.f32 0.5, %v926_v8 }
 0x7a7   :  { %v913_v12 = vmul.f32 0.6931472, %v1311_v10 }
 0x7a8   :  { %v940_v13 = vsub.f32 %v932_v48, %v939_v11 }
 0x7a9   :  { %v914_v2 = vsub.f32 %v906_v55, %v913_v12 }
 0x7aa   :  { %v941_v14 = vmul.f32 0.5, %v940_v13 }
 0x7ab   :  { %v928_v15 = vadd.f32 %v927_v1, %v914_v2 }
 0x7ad   :  { %v942_v16 = vadd.f32 %v941_v14, %v928_v15 }
 0x7af   :  { %v950_v17 = vrot.slane %v942_v16, %v1650_v24 }
 0x7b1   :  { %v951_v18 = vcombine.high %v950_v17, %v950_v17  ;;  %1137 = vst.sshfl [vmem:[#allocation8] sm:$0x1 pattern:$0x73625140] %v950_v17 }
 0x7b3   :  { %1138 = vst.sshfl [vmem:[#allocation8 + $0x8] sm:$0x1 pattern:$0x73625140] %v951_v18 }
 0x7b4   :  { %1367 = shalt.err (!%p1364_p6)
}
 0x7b5   :  { %s1368_s23 = scalar_lea.hbm %s1766_s21, 256 }
 0x7b6   :  { %p1369_p7 = scmp.ne.s32.totalorder %s1766_s21, %s1368_s23  ;;  %p1372_p8 = scmp.lt.u32.totalorder %s1368_s23, %s1766_s21 }
 0x7b8   :  { %p1374_p9 = pnand %p1372_p8, %p1369_p7 }
 0x7ba   :  { %1377 = shalt.err (!%p1374_p9)
}
 0x7bb   :  { %s1391_s12 = smov 128   ;;  %s1392_s29 = smov 8  }
 0x7bc   :  { %1095 = dma.vmem_to_hbm [thread:$0]  %s1090_s0, 256, %s1766_s21, [#allocation5], %s1391_s12, %s1391_s12, %s1392_s29  }
 0x7bd   :  { %1382 = dma.done.wait [#allocation5], 256  }
 0x7be   :  { %1383 = vsyncadd [#allocation5], 4294967040 }
 0x7bf   :  { %1099 = vsyncpa [#allocation4], 1 }
 0x7c0   :  { %1100 = vsyncpa [#allocation7], 1 }
 0x7c1   :  { %1101 = vsyncpa [#allocation5], 1 }

// kernel: tpu_custom_call.1
= control target key start
LH: loop header
LB: loop body
LE: loop exit
PB: predicated region body
PF: predicated region fallthrough
CT: control target
= control target key end

     0   :  { %s1745_s0 = inlined_call_operand.vmem [shape: bf16[2,16,32], index: 0, kind: input, shape index: {}]   ;;  %s1746_s1 = inlined_call_operand.vmem [shape: f32[2,1,10], index: 1, kind: input, shape index: {}]   ;;  %s1747_s2 = inlined_call_operand.vmem [shape: bf16[32,32], index: 2, kind: input, shape index: {}]   ;;  %s1748_s3 = inlined_call_operand.hbm [shape: f32[1,32], index: 3, kind: input, shape index: {}]   ;;  %s1749_s4 = inlined_call_operand.vmem [shape: bf16[32,16], index: 4, kind: input, shape index: {}]   ;;  %s1750_s5 = inlined_call_operand.hbm [shape: f32[1,16], index: 5, kind: input, shape index: {}]   ;;  %s1751_s6 = inlined_call_operand.vmem [shape: bf16[16,128], index: 6, kind: input, shape index: {}]   ;;  %s1752_s7 = inlined_call_operand.vmem [shape: f32[1,128], index: 7, kind: input, shape index: {}]   ;;  %s1753_s8 = inlined_call_operand.vmem [shape: bf16[10,10], index: 8, kind: input, shape index: {}]   ;;  %s1754_s9 = inlined_call_operand.vmem [shape: f32[1,10], index: 9, kind: input, shape index: {}]   ;;  %s1755_s10 = inlined_call_operand.vmem [shape: bf16[10,5], index: 10, kind: input, shape index: {}]   ;;  %s1756_s11 = inlined_call_operand.vmem [shape: f32[1,5], index: 11, kind: input, shape index: {}]   ;;  %s1757_s12 = inlined_call_operand.vmem [shape: bf16[5,128], index: 12, kind: input, shape index: {}]   ;;  %s1758_s13 = inlined_call_operand.vmem [shape: f32[1,128], index: 13, kind: input, shape index: {}]   ;;  %s1759_s14 = inlined_call_operand.vmem [shape: bf16[32,21], index: 14, kind: input, shape index: {}]   ;;  %s1760_s15 = inlined_call_operand.vmem [shape: bf16[10,21], index: 15, kind: input, shape index: {}]   ;;  %s1761_s16 = inlined_call_operand.vmem [shape: f32[1,21], index: 16, kind: input, shape index: {}]   ;;  %s1762_s17 = inlined_call_operand.vmem [shape: bf16[21,10], index: 17, kind: input, shape index: {}]   ;;  %s1763_s18 = inlined_call_operand.vmem [shape: f32[1,10], index: 18, kind: input, shape index: {}]   ;;  %s1764_s19 = inlined_call_operand.vmem [shape: bf16[10,128], index: 19, kind: input, shape index: {}]   ;;  %s1765_s20 = inlined_call_operand.vmem [shape: f32[1,128], index: 20, kind: input, shape index: {}]   ;;  %s1766_s21 = inlined_call_operand.hbm [shape: f32[2,8,128], index: 21, kind: output, shape index: {}]  }
   0x1   :  { %1773 = sst [smem:[#allocation12_spill]] %s1745_s0 }
   0x2   :  { %1774 = sst [smem:[#allocation13_spill]] %s1746_s1 }
   0x3   :  { %1775 = sst [smem:[#allocation14_spill]] %s1747_s2 }
   0x4   :  { %1776 = sst [smem:[#allocation15_spill]] %s1748_s3 }
   0x5   :  { %1777 = sst [smem:[#allocation16_spill]] %s1749_s4 }
   0x6   :  { %1778 = sst [smem:[#allocation17_spill]] %s1750_s5 }
   0x7   :  { %26 = vsyncpa [#allocation4], 0 }
   0x8   :  { %27 = vsyncpa [#allocation7], 0 }
   0x9   :  { %28 = vsyncpa [#allocation5], 0  ;;  %s1384_s2 = smov [#allocation3]   ;;  %s1385_s26 = smov [#allocation6]  }
   0xa   :  { %s41_s25 = sshll.u32 %s1384_s2, 4  ;;  %s53_s27 = sshll.u32 %s1385_s26, 4  ;;  %s42_s25 = int_to_ptr.vmem [resolvable:$true] %s41_s25  ;;  %s54_s27 = int_to_ptr.vmem [resolvable:$true] %s53_s27 }
   0xb   :  { %s1779_s29 = sld [smem:[#allocation15_spill]] }
  0x11   :  { %s1312_s0 = scalar_lea.hbm %s1779_s29, 16 }
  0x12   :  { %p1313_p0 = scmp.ne.s32.totalorder %s1779_s29, %s1312_s0  ;;  %p1316_p1 = scmp.lt.u32.totalorder %s1312_s0, %s1779_s29 }
  0x14   :  { %p1318_p2 = pnand %p1316_p1, %p1313_p0 }
  0x16   :  { %1321 = shalt.err (!%p1318_p2)
}
  0x17   :  { %s1322_s23 = scalar_lea.vmem %s42_s25, 16  ;;  %s1326_s1 = scalar_lea.vmem %s42_s25, 32 }
  0x18   :  { %p1323_p3 = scmp.ne.s32.totalorder %s42_s25, %s1322_s23  ;;  %p1327_p4 = scmp.lt.s32.totalorder %s42_s25, %s42_s25 }
  0x19   :  { %p1328_p5 = scmp.lt.s32.totalorder %s1326_s1, %s1322_s23 }
  0x1b   :  { %p1329_p6 = por %p1328_p5, %p1327_p4 }
  0x1d   :  { %p1330_p7 = pnand %p1329_p6, %p1323_p3 }
  0x1f   :  { %1333 = shalt.err (!%p1330_p7)
}
  0x20   :  { %44 = dma.hbm_to_vmem [thread:$0]  %s1779_s29, 16, %s42_s25, [#allocation4]  }
  0x21   :  { %s1780_s28 = sld [smem:[#allocation17_spill]] }
  0x27   :  { %s1334_s4 = scalar_lea.hbm %s1780_s28, 16 }
  0x28   :  { %p1335_p8 = scmp.ne.s32.totalorder %s1780_s28, %s1334_s4  ;;  %p1338_p9 = scmp.lt.u32.totalorder %s1334_s4, %s1780_s28 }
  0x2a   :  { %p1340_p10 = pnand %p1338_p9, %p1335_p8 }
  0x2c   :  { %1343 = shalt.err (!%p1340_p10)
}
  0x2d   :  { %s1344_s23 = scalar_lea.vmem %s54_s27, 16  ;;  %s1348_s1 = scalar_lea.vmem %s54_s27, 32 }
  0x2e   :  { %p1345_p11 = scmp.ne.s32.totalorder %s54_s27, %s1344_s23  ;;  %p1349_p12 = scmp.lt.s32.totalorder %s54_s27, %s54_s27 }
  0x2f   :  { %p1350_p13 = scmp.lt.s32.totalorder %s1348_s1, %s1344_s23 }
  0x31   :  { %p1351_p0 = por %p1350_p13, %p1349_p12 }
  0x33   :  { %p1352_p1 = pnand %p1351_p0, %p1345_p11 }
  0x35   :  { %1355 = shalt.err (!%p1352_p1)
}
  0x36   :  { %56 = dma.hbm_to_vmem [thread:$0]  %s1780_s28, 16, %s54_s27, [#allocation7]  }
  0x37   :  { %1378 = dma.done.wait [#allocation4], 16  }
  0x38   :  { %1379 = vsyncadd [#allocation4], 4294967280 }
  0x39   :  { %1380 = dma.done.wait [#allocation7], 16  }
  0x3a   :  { %1381 = vsyncadd [#allocation7], 4294967280  ;;  %vm98_vm0 = vcmask 254976   ;;  %v1386_v0 = vmov 0.0   ;;  %vm1387_vm1 = vmmov 0   ;;  %s1781_s2 = sld [smem:[#allocation14_spill]] }
  0x3b   :  { %1188 = vmatprep.subr.bf16.mxu0 %v1386_v0  ;;  %1078 = vst [vmem:[#allocation8 + $0x5] sm:$0x1] %v1386_v0  ;;  %1079 = vst [vmem:[#allocation8 + $0xd] sm:$0x1] %v1386_v0  ;;  %1192 = vmatprep.mubr.msk.bf16.mxu0 %vm1387_vm1, %v1386_v0  ;;  %s1782_s30 = sld [smem:[#allocation12_spill]]  ;;  %vm109_vm2 = vcmask 261120  }
  0x3c   :  { %1080 = vst [vmem:[#allocation8 + $0x6] sm:$0x1] %v1386_v0  ;;  %1081 = vst [vmem:[#allocation8 + $0xe] sm:$0x1] %v1386_v0  ;;  %1196 = vmatprep.subr.bf16.mxu1 %v1386_v0  ;;  %1200 = vmatprep.mubr.msk.bf16.mxu1 %vm1387_vm1, %v1386_v0  ;;  %s1783_s1 = sld [smem:[#allocation16_spill]]  ;;  %vm130_vm3 = vcmask 1041409  }
  0x3d   :  { %1082 = vst [vmem:[#allocation8 + $0x7] sm:$0x1] %v1386_v0  ;;  %1083 = vst [vmem:[#allocation8 + $0xf] sm:$0x1] %v1386_v0  ;;  %v1587_v35 = vld [vmem:[%s1751_s6] sm:$0xff]   ;;  %s1784_s3 = sld [smem:[#allocation13_spill]] }
  0x3e   :  { %99 = vst.msk [vmem:[#allocation2] sm:$0x3] %vm98_vm0, %v1386_v0  ;;  %v1597_v39 = vld [vmem:[#allocation3] ss:$0 sm:$0xff]  ;;  %vm365_vm4 = vcmask 1044480   ;;  %vm361_vm5 = vcmask 80896  }
  0x3f   :  { %v1291_v42 = vld [vmem:[%s1753_s8] sm:$0x1f]   ;;  %vm292_vm6 = vcmask 130048   ;;  %vm484_vm7 = vcmask 1041408   ;;  %vm485_vm8 = vcmask 1042432   ;;  %vm480_vm9 = vcmask 39936  }
  0x40   :  { %v1544_v1 = vld [vmem:[%s1781_s2] sm:$0xff]   ;;  %v1550_v2 = vld [vmem:[%s1781_s2 + $0x8] sm:$0xff]   ;;  %v367_v51 = vsel %vm365_vm4, %v1291_v42, 0  ;;  %vm666_vm10 = vcmask 171008  }
  0x41   :  { %1189 = vmatpush3.bf16.msra.mxu0 %v1544_v1  ;;  %v1148_v3 = vld [vmem:[%s1782_s30] sm:$0xff]   ;;  %v1155_v4 = vld [vmem:[%s1782_s30 + $0x8] sm:$0xff]  }
  0x42   :  { %1190 = vmatprep.subr.bf16.mxu0 %v1386_v0  ;;  %v1149_v5 = vunpack.c.l.bf16 %v1148_v3  ;;  %v1150_v6 = vunpack.c.h.bf16 %v1148_v3  ;;  %v1153_v7 = vunpack.c.l.bf16 %v1155_v4  ;;  %v1154_v8 = vunpack.c.h.bf16 %v1155_v4  ;;  %v1562_v9 = vld [vmem:[%s1783_s1] sm:$0xff]   ;;  %v1580_v34 = vld [vmem:[%s1783_s1 + $0x8] sm:$0xff]  }
  0x43   :  { %1197 = vmatpush3.bf16.msra.mxu1 %v1562_v9  ;;  %v337_v36 = vld [vmem:[%s1784_s3 + $0x1] sm:$0x1]  ;;  %v336_v38 = vld [vmem:[%s1784_s3] sm:$0x1]  ;;  %v1615_v54 = vld [vmem:[#allocation6] ss:$0 sm:$0xff] }
  0x44   :  { %v110_v10 = vsel %vm109_vm2, %v1149_v5, 0.0  ;;  %v111_v11 = vsel %vm109_vm2, %v1150_v6, 0.0  ;;  %v119_v12 = vsel %vm109_vm2, %v1153_v7, 0.0  ;;  %v120_v13 = vsel %vm109_vm2, %v1154_v8, 0.0  ;;  %1198 = vmatprep.subr.bf16.mxu1 %v1386_v0  ;;  %v1293_v58 = vld [vmem:[%s1755_s10] sm:$0x1f]  }
  0x45   :  { %1191 = vmatpush3.bf16.msra.mxu0 %v1550_v2  ;;  %v112_v14 = vadd.f32 %v111_v11, %v110_v10  ;;  %v121_v15 = vadd.f32 %v120_v13, %v119_v12  ;;  %v108_v26 = vld [vmem:[#allocation2] sm:$0x3]  ;;  %v339_v37 = vpack.c.bf16 %v337_v36, %v337_v36  ;;  %v338_v40 = vpack.c.bf16 %v336_v38, %v336_v38 }
  0x46   :  { %1204 = vmatprep.subr.bf16.mxu0 %v1386_v0  ;;  %v428_v63 = vsel %vm365_vm4, %v1293_v58, 0  ;;  %v1113_v3 = vld [vmem:[%s1754_s9] ss:$0 sm:$0xff] }
  0x47   :  { %v113_v16 = vrot.slane %v112_v14, 4  ;;  %v122_v17 = vrot.slane %v121_v15, 4  ;;  %1199 = vmatpush3.bf16.msra.mxu1 %v1580_v34  ;;  %v352_v41 = vunpack.c.l.b16 %v339_v37  ;;  %v351_v47 = vunpack.c.l.b16 %v338_v40  ;;  %v1294_v7 = vld [vmem:[%s1760_s15] sm:$0x1f]  }
  0x48   :  { %1210 = vmatprep.subr.bf16.mxu1 %v1386_v0  ;;  %v543_v12 = vsel %vm365_vm4, %v1294_v7, 0  ;;  %v472_v13 = vld [vmem:[%s1757_s12] sm:$0x7] }
  0x49   :  { %v114_v18 = vadd.f32 %v113_v16, %v112_v14  ;;  %v123_v19 = vadd.f32 %v122_v17, %v121_v15  ;;  %v353_v48 = vrot.slane %v352_v41, 7  ;;  %v1388_v14 = vmov 65535   ;;  %v1295_v42 = vld [vmem:[%s1759_s14] sm:$0xff]  }
  0x4a   :  { %v486_v15 = vsel %vm484_vm7, 4294967295, %v1388_v14 }
  0x4b   :  { %v115_v20 = vrot.slane %v114_v18, 2  ;;  %v124_v21 = vrot.slane %v123_v19, 2  ;;  %v354_v52 = vsel %vm130_vm3, %v353_v48, %v351_v47  ;;  %v487_v16 = vsel %vm485_vm8, %v486_v15, 0 }
  0x4c   :  { %v355_v53 = vpack.c.b16 %v354_v52, %v354_v52  ;;  %v489_v17 = vand.u32 %v487_v16, %v472_v13 }
  0x4d   :  { %v116_v22 = vadd.f32 %v115_v20, %v114_v18  ;;  %v125_v23 = vadd.f32 %v124_v21, %v123_v19  ;;  %v1389_v18 = vmov 1966171168   ;;  %v947_v20 = vlaneseq }
  0x4e   :  { %v945_v19 = vunpack.c.l.s4 %v1389_v18 }
  0x4f   :  { %v117_v24 = vrot.slane %v116_v22, 1  ;;  %v126_v25 = vrot.slane %v125_v23, 1 }
  0x50   :  { %v946_v21 = vunpack.c.0.s8 %v945_v19 }
  0x51   :  { %v118_v27 = vadd.f32 %v117_v24, %v116_v22  ;;  %v127_v28 = vadd.f32 %v126_v25, %v125_v23  ;;  %v948_v22 = vshrl.u32 %v947_v20, 7  ;;  %v1648_v23 = vld [vmem:[%s1752_s7] ss:$0 sm:$0xff] }
  0x53   :  { %v131_v29 = vsel %vm130_vm3, %v127_v28, %v118_v27  ;;  %v1650_v24 = vsub.s32 %v946_v21, %v948_v22 }
  0x54   :  { %v133_v30 = vadd.f32 %v131_v29, %v108_v26 }
  0x56   :  { %135 = vst.msk [vmem:[#allocation2] sm:$0x3] %vm98_vm0, %v133_v30 }
  0x5d   :  { %v139_v31 = vld [vmem:[#allocation2] sm:$0x3] }
  0x5e   :  { %v140_v32 = vmul.f32 0.0625, %v139_v31 }
  0x60   :  { %v141_v33 = vpack.c.bf16 %v140_v32, %v140_v32  ;;  %v1116_v32 = vld [vmem:[%s1756_s11] ss:$0 sm:$0xff] }
  0x62   :  { %1193 = vmatmul.mubr.msk.bf16.vlgmr.msra.gmra.mrb[0].mxu0 %vm109_vm2, %v141_v33 }
  0x63   :  { %1206 = vmatprep.mubr.msk.bf16.mxu0 %vm1387_vm1, %v1386_v0  ;;  %1205 = vmatpush3.bf16.msra.mxu0 %v1587_v35 }
  0x64   :  { %1216 = vmatprep.subr.bf16.mxu0 %v1386_v0 }
 0x135   :  { %v202_v43 = vpop.f32.mrb[0].mxu0 }
 0x136   :  { %v203_v44 = vadd.f32 %v1597_v39, %v202_v43  ;;  %v1194_v45 = vpop.f32.mrb[1].mxu0 }
 0x137   :  { %v205_v46 = vpop.f32.mrb[2].mxu0  ;;  %v1296_v45 = vld [vmem:[%s1759_s14 + $0x8] sm:$0xff]  }
 0x138   :  { %v1603_v49 = vpack.c.bf16 %v203_v44, %v203_v44  ;;  %v1195_v50 = vpop.f32.mrb[3].mxu0 }
 0x139   :  { %v1297_v50 = vld [vmem:[%s1762_s17] sm:$0xff]  }
 0x13a   :  { %1201 = vmatmul.mubr.msk.bf16.vlgmr.msra.gmra.mrb[0].mxu1 %vm109_vm2, %v1603_v49 }
 0x13b   :  { %1211 = vmatpush3.bf16.msra.mxu1 %v367_v51  ;;  %1212 = vmatprep.mubr.msk.bf16.mxu1 %vm1387_vm1, %v1386_v0  ;;  %v1298_v51 = vld [vmem:[%s1762_s17 + $0x8] ss:$0 sps:$4 sm:$0x77]  }
 0x13c   :  { %1222 = vmatprep.subr.bf16.mxu1 %v1386_v0  ;;  %v671_v52 = vand.u32 %v1298_v51, %v487_v16 }
 0x142   :  { %1213 = vmatmul.mubr.msk.bf16.vlgmr.msra.gmra.mrb[4].mxu1 %vm361_vm5, %v355_v53  ;;  %v1119_v53 = vld [vmem:[%s1758_s13] ss:$0 sm:$0xff] }
 0x143   :  { %1224 = vmatprep.mubr.msk.bf16.mxu1 %vm1387_vm1, %v1386_v0  ;;  %1223 = vmatpush3.bf16.msra.mxu1 %v489_v17 }
 0x144   :  { %1234 = vmatprep.subr.bf16.mxu1 %v1386_v0 }
 0x20d   :  { %v269_v55 = vpop.f32.mrb[0].mxu1 }
 0x20e   :  { %v270_v56 = vadd.f32 %v1615_v54, %v269_v55  ;;  %v1202_v57 = vpop.f32.mrb[1].mxu1 }
 0x20f   :  { %v272_v59 = vpop.f32.mrb[2].mxu1 }
 0x210   :  { %v275_v60 = vmax.f32 %v270_v56, 0.0  ;;  %v1203_v61 = vpop.f32.mrb[3].mxu1 }
 0x212   :  { %v276_v62 = vpack.c.bf16 %v275_v60, %v275_v60 }
 0x214   :  { %1207 = vmatmul.mubr.msk.bf16.vlgmr.msra.gmra.mrb[4].mxu0 %vm292_vm6, %v276_v62 }
 0x215   :  { %1217 = vmatpush3.bf16.msra.mxu0 %v428_v63  ;;  %v403_v4 = vpop.f32.mrb[4].mxu1  ;;  %1218 = vmatprep.mubr.msk.bf16.mxu0 %vm1387_vm1, %v1386_v0 }
 0x216   :  { %v404_v5 = vadd.f32 %v1113_v3, %v403_v4  ;;  %v1214_v6 = vpop.f32.mrb[5].mxu1  ;;  %1228 = vmatprep.subr.bf16.mxu0 %v1386_v0  ;;  %v1126_v3 = vld [vmem:[%s1761_s16] ss:$0 sm:$0xff] }
 0x217   :  { %v406_v8 = vpop.f32.mrb[6].mxu1 }
 0x218   :  { %v409_v10 = vpack.c.bf16 %v404_v5, %v404_v5  ;;  %v1215_v11 = vpop.f32.mrb[7].mxu1 }
 0x21c   :  { %1219 = vmatmul.mubr.msk.bf16.vlgmr.msra.gmra.mrb[8].mxu0 %vm361_vm5, %v409_v10 }
 0x21d   :  { %1229 = vmatpush3.bf16.msra.mxu0 %v543_v12  ;;  %1230 = vmatprep.mubr.msk.bf16.mxu0 %vm1387_vm1, %v1386_v0  ;;  %v1299_v12 = vld [vmem:[%s1764_s19] sm:$0x1f]  }
 0x21e   :  { %1242 = vmatprep.subr.bf16.mxu0 %v1386_v0  ;;  %v732_v13 = vsel %vm365_vm4, %v1299_v12, 0 }
 0x224   :  { %1231 = vmatmul.mubr.msk.bf16.vlgmr.msra.gmra.mrb[12].mxu0 %vm361_vm5, %v409_v10 }
 0x225   :  { %1246 = vmatprep.mubr.msk.bf16.mxu0 %vm1387_vm1, %v1386_v0  ;;  %1243 = vmatpush3.bf16.msra.mxu0 %v1297_v50 }
 0x226   :  { %1244 = vmatprep.subr.bf16.mxu0 %v1386_v0 }
 0x229   :  { %1245 = vmatpush3.bf16.msra.mxu0 %v671_v52 }
 0x22a   :  { %1256 = vmatprep.subr.bf16.mxu0 %v1386_v0 }
 0x2e7   :  { %v330_v25 = vpop.f32.mrb[4].mxu0 }
 0x2e8   :  { %v331_v26 = vadd.f32 %v1648_v23, %v330_v25  ;;  %v1208_v27 = vpop.f32.mrb[5].mxu0 }
 0x2e9   :  { %v333_v28 = vpop.f32.mrb[6].mxu0 }
 0x2ea   :  { %v1058_v29 = vrot.slane %v331_v26, %v1650_v24  ;;  %v1209_v30 = vpop.f32.mrb[7].mxu0 }
 0x2ec   :  { %v1059_v31 = vcombine.high %v1058_v29, %v1058_v29  ;;  %1145 = vst.sshfl [vmem:[#allocation8 + $0x4] sm:$0x1 pattern:$0x73625140] %v1058_v29 }
 0x2ee   :  { %1146 = vst.sshfl [vmem:[#allocation8 + $0xc] sm:$0x1 pattern:$0x73625140] %v1059_v31 }
 0x2ef   :  { %v464_v33 = vpop.f32.mrb[8].mxu0 }
 0x2f0   :  { %v465_v36 = vadd.f32 %v1116_v32, %v464_v33  ;;  %v1220_v37 = vpop.f32.mrb[9].mxu0 }
 0x2f1   :  { %v467_v38 = vpop.f32.mrb[10].mxu0 }
 0x2f2   :  { %v470_v40 = vmax.f32 %v465_v36, 0.0  ;;  %v1221_v41 = vpop.f32.mrb[11].mxu0 }
 0x2f4   :  { %v471_v43 = vpack.c.bf16 %v470_v40, %v470_v40 }
 0x2f6   :  { %1225 = vmatmul.mubr.msk.bf16.vlgmr.msra.gmra.mrb[8].mxu1 %vm480_vm9, %v471_v43 }
 0x2f7   :  { %1235 = vmatpush3.bf16.msra.mxu1 %v1295_v42  ;;  %v579_v44 = vpop.f32.mrb[12].mxu0  ;;  %1238 = vmatprep.mubr.msk.bf16.mxu1 %vm1387_vm1, %v1386_v0 }
 0x2f8   :  { %v1232_v46 = vpop.f32.mrb[13].mxu0  ;;  %1236 = vmatprep.subr.bf16.mxu1 %v1386_v0 }
 0x2f9   :  { %v582_v47 = vpop.f32.mrb[14].mxu0 }
 0x2fa   :  { %v1233_v48 = vpop.f32.mrb[15].mxu0 }
 0x2fb   :  { %1237 = vmatpush3.bf16.msra.mxu1 %v1296_v45 }
 0x2fc   :  { %1250 = vmatprep.subr.bf16.mxu1 %v1386_v0 }
 0x2fe   :  { %1239 = vmatmul.mubr.msk.bf16.vlgmr.msra.gmra.mrb[12].mxu1 %vm109_vm2, %v1603_v49 }
 0x2ff   :  { %1252 = vmatprep.mubr.msk.bf16.mxu1 %vm1387_vm1, %v1386_v0  ;;  %1251 = vmatpush3.bf16.msra.mxu1 %v732_v13 }
 0x300   :  { %1264 = vmatprep.subr.bf16.mxu1 %v1386_v0 }
 0x3c9   :  { %v525_v55 = vpop.f32.mrb[8].mxu1 }
 0x3ca   :  { %v1682_v56 = vadd.f32 %v1119_v53, %v525_v55  ;;  %v1226_v57 = vpop.f32.mrb[9].mxu1 }
 0x3cb   :  { %v528_v58 = vpop.f32.mrb[10].mxu1 }
 0x3cc   :  { %v1031_v59 = vrot.slane %v1682_v56, %v1650_v24  ;;  %v1227_v60 = vpop.f32.mrb[11].mxu1  ;;  %v929_v61 = vsel %vm484_vm7, %v1682_v56, -inf }
 0x3cd   :  { %930 = vmax.xlane.f32.xlu1 %v929_v61 }
 0x3ce   :  { %v1032_v62 = vcombine.high %v1031_v59, %v1031_v59  ;;  %1143 = vst.sshfl [vmem:[#allocation8 + $0x3] sm:$0x1 pattern:$0x73625140] %v1031_v59 }
 0x3d0   :  { %1144 = vst.sshfl [vmem:[#allocation8 + $0xb] sm:$0x1 pattern:$0x73625140] %v1032_v62 }
 0x3d1   :  { %v631_v63 = vpop.f32.mrb[12].mxu1 }
 0x3d2   :  { %v632_v4 = vadd.f32 %v631_v63, %v579_v44  ;;  %v1240_v5 = vpop.f32.mrb[13].mxu1 }
 0x3d3   :  { %v634_v6 = vpop.f32.mrb[14].mxu1 }
 0x3d4   :  { %v644_v7 = vadd.f32 %v1126_v3, %v632_v4  ;;  %v1241_v8 = vpop.f32.mrb[15].mxu1 }
 0x3d6   :  { %v645_v10 = vmax.f32 %v644_v7, 0.0 }
 0x3d8   :  { %v646_v11 = vpack.c.bf16 %v645_v10, %v645_v10 }
 0x3da   :  { %1247 = vmatmul.mubr.msk.bf16.vlgmr.msra.gmra.mrb[16].mxu0 %vm666_vm10, %v646_v11 }
 0x3db   :  { %1257 = vmatpush3.bf16.msra.mxu0 %v1544_v1  ;;  %1260 = vmatprep.mubr.msk.bf16.mxu0 %vm1387_vm1, %v1386_v0  ;;  %v1127_v1 = vld [vmem:[%s1763_s18] ss:$0 sm:$0xff] }
 0x3dc   :  { %1258 = vmatprep.subr.bf16.mxu0 %v1386_v0 }
 0x3df   :  { %1259 = vmatpush3.bf16.msra.mxu0 %v1550_v2 }
 0x3e0   :  { %1272 = vmatprep.subr.bf16.mxu0 %v1386_v0 }
 0x3e2   :  { %1261 = vmatmul.mubr.msk.bf16.vlgmr.msra.gmra.mrb[20].mxu0 %vm109_vm2, %v1603_v49 }
 0x3e3   :  { %1273 = vmatpush3.bf16.msra.mxu0 %v1587_v35  ;;  %1274 = vmatprep.mubr.msk.bf16.mxu0 %vm1387_vm1, %v1386_v0 }
 0x45a   :  { %v931_v47 = vpop.xlane.xlu1 %930 }
 0x45b   :  { %v932_v48 = vsub.f32 %v1682_v56, %v931_v47 }
 0x4ad   :  { %v707_v2 = vpop.f32.mrb[16].mxu0 }
 0x4ae   :  { %v708_v14 = vadd.f32 %v1127_v1, %v707_v2  ;;  %v1248_v15 = vpop.f32.mrb[17].mxu0 }
 0x4af   :  { %v710_v16 = vpop.f32.mrb[18].mxu0 }
 0x4b0   :  { %v713_v17 = vpack.c.bf16 %v708_v14, %v708_v14  ;;  %v1249_v18 = vpop.f32.mrb[19].mxu0 }
 0x4b2   :  { %1253 = vmatmul.mubr.msk.bf16.vlgmr.msra.gmra.mrb[16].mxu1 %vm361_vm5, %v713_v17 }
 0x4b3   :  { %1265 = vmatpush3.bf16.msra.mxu1 %v1562_v9  ;;  %1268 = vmatprep.mubr.msk.bf16.mxu1 %vm1387_vm1, %v1386_v0  ;;  %v1131_v9 = vld [vmem:[%s1765_s20] ss:$0 sm:$0xff]  ;;  %s1390_s20 = smov [#allocation8]  }
 0x4b4   :  { %1266 = vmatprep.subr.bf16.mxu1 %v1386_v0  ;;  %s1089_s0 = sshll.u32 %s1390_s20, 4  ;;  %s1090_s0 = int_to_ptr.vmem [resolvable:$true] %s1089_s0 }
 0x4b5   :  { %v808_v35 = vpop.f32.mrb[20].mxu0  ;;  %s1356_s5 = scalar_lea.vmem %s1090_s0, 256  ;;  %p1361_p3 = scmp.lt.s32.totalorder %s1090_s0, %s1090_s0 }
 0x4b6   :  { %v809_v49 = vadd.f32 %v1597_v39, %v808_v35  ;;  %v1262_v19 = vpop.f32.mrb[21].mxu0  ;;  %p1357_p2 = scmp.ne.s32.totalorder %s1090_s0, %s1356_s5  ;;  %p1362_p4 = scmp.lt.s32.totalorder %s1356_s5, %s1356_s5 }
 0x4b7   :  { %1267 = vmatpush3.bf16.msra.mxu1 %v1580_v34  ;;  %v811_v20 = vpop.f32.mrb[22].mxu0 }
 0x4b8   :  { %v814_v21 = vpack.c.bf16 %v809_v49, %v809_v49  ;;  %v1263_v22 = vpop.f32.mrb[23].mxu0  ;;  %p1363_p5 = por %p1362_p4, %p1361_p3 }
 0x4ba   :  { %1269 = vmatmul.mubr.msk.bf16.vlgmr.msra.gmra.mrb[20].mxu1 %vm109_vm2, %v814_v21  ;;  %p1364_p6 = pnand %p1363_p5, %p1357_p2 }
 0x585   :  { %v768_v25 = vpop.f32.mrb[16].mxu1 }
 0x586   :  { %v769_v26 = vadd.f32 %v1131_v9, %v768_v25  ;;  %v1254_v27 = vpop.f32.mrb[17].mxu1 }
 0x587   :  { %v771_v28 = vpop.f32.mrb[18].mxu1 }
 0x588   :  { %v977_v0 = vrot.slane %v769_v26, %v1650_v24  ;;  %v1255_v29 = vpop.f32.mrb[19].mxu1 }
 0x58a   :  { %v978_v39 = vcombine.high %v977_v0, %v977_v0  ;;  %1139 = vst.sshfl [vmem:[#allocation8 + $0x1] sm:$0x1 pattern:$0x73625140] %v977_v0 }
 0x58c   :  { %1140 = vst.sshfl [vmem:[#allocation8 + $0x9] sm:$0x1 pattern:$0x73625140] %v978_v39 }
 0x58d   :  { %v852_v34 = vpop.f32.mrb[20].mxu1 }
 0x58e   :  { %v853_v30 = vadd.f32 %v1615_v54, %v852_v34  ;;  %v1270_v31 = vpop.f32.mrb[21].mxu1  ;;  %v903_v54 = vsel %vm484_vm7, %v769_v26, -inf }
 0x58f   :  { %v855_v32 = vpop.f32.mrb[22].mxu1 }
 0x590   :  { %v858_v33 = vmax.f32 %v853_v30, 0.0  ;;  %v1271_v36 = vpop.f32.mrb[23].mxu1 }
 0x592   :  { %v859_v37 = vpack.c.bf16 %v858_v33, %v858_v33 }
 0x594   :  { %1275 = vmatmul.mubr.msk.bf16.vlgmr.msra.gmra.mrb[24].mxu0 %vm292_vm6, %v859_v37 }
 0x667   :  { %v897_v38 = vpop.f32.mrb[24].mxu0 }
 0x668   :  { %v898_v40 = vadd.f32 %v1648_v23, %v897_v38  ;;  %v1276_v41 = vpop.f32.mrb[25].mxu0  ;;  %v933_v23 = vmul.f32 1.442695, %v932_v48 }
 0x669   :  { %v900_v42 = vpop.f32.mrb[26].mxu0 }
 0x66a   :  { %v1004_v43 = vrot.slane %v898_v40, %v1650_v24  ;;  %v1277_v44 = vpop.f32.mrb[27].mxu0  ;;  %v915_v45 = vsel %vm484_vm7, %v898_v40, -inf }
 0x66b   :  { %916 = vmax.xlane.f32.xlu0 %v915_v45 }
 0x66c   :  { %v1005_v46 = vcombine.high %v1004_v43, %v1004_v43  ;;  %1141 = vst.sshfl [vmem:[#allocation8 + $0x2] sm:$0x1 pattern:$0x73625140] %v1004_v43 }
 0x66e   :  { %1142 = vst.sshfl [vmem:[#allocation8 + $0xa] sm:$0x1 pattern:$0x73625140] %v1005_v46 }
 0x66f   :  { %904 = vmax.xlane.f32.xlu0 %v903_v54 }
 0x6f8   :  { %v917_v50 = vpop.xlane.xlu0 %916 }
 0x6f9   :  { %v918_v51 = vsub.f32 %v898_v40, %v917_v50 }
 0x6fb   :  { %v919_v52 = vmul.f32 1.442695, %v918_v51 }
 0x6fc   :  { %v905_v53 = vpop.xlane.xlu0 %904 }
 0x6fd   :  { %1300 = vpow2.f32 %v919_v52  ;;  %v906_v55 = vsub.f32 %v769_v26, %v905_v53 }
 0x6fe   :  { %1302 = vpow2.f32 %v933_v23 }
 0x6ff   :  { %v907_v57 = vmul.f32 1.442695, %v906_v55 }
 0x701   :  { %1304 = vpow2.f32 %v907_v57 }
 0x707   :  { %v1301_v58 = vpop.eup %1300 }
 0x708   :  { %v921_v59 = vsel %vm484_vm7, %v1301_v58, 0.0  ;;  %v1303_v60 = vpop.eup %1302 }
 0x709   :  { %922 = vadd.xlane.f32.xlu1 %v921_v59  ;;  %v935_v62 = vsel %vm484_vm7, %v1303_v60, 0.0 }
 0x70b   :  { %v1305_v61 = vpop.eup %1304 }
 0x70c   :  { %v909_v56 = vsel %vm484_vm7, %v1305_v61, 0.0 }
 0x70d   :  { %936 = vadd.xlane.f32.xlu1 %v935_v62  ;;  %910 = vadd.xlane.f32.xlu0 %v909_v56 }
 0x796   :  { %v923_v63 = vpop.xlane.xlu1 %922 }
 0x797   :  { %1306 = vlog2.f32 %v923_v63 }
 0x79a   :  { %v937_v3 = vpop.xlane.xlu1 %936  ;;  %v911_v4 = vpop.xlane.xlu0 %910 }
 0x79b   :  { %1308 = vlog2.f32 %v937_v3 }
 0x79c   :  { %1310 = vlog2.f32 %v911_v4 }
 0x7a1   :  { %v1307_v5 = vpop.eup %1306 }
 0x7a2   :  { %v925_v6 = vmul.f32 0.6931472, %v1307_v5 }
 0x7a4   :  { %v926_v8 = vsub.f32 %v918_v51, %v925_v6 }
 0x7a5   :  { %v1309_v7 = vpop.eup %1308 }
 0x7a6   :  { %v1311_v10 = vpop.eup %1310  ;;  %v939_v11 = vmul.f32 0.6931472, %v1309_v7  ;;  %v927_v1 = vmul.f32 0.5, %v926_v8 }
 0x7a7   :  { %v913_v12 = vmul.f32 0.6931472, %v1311_v10 }
 0x7a8   :  { %v940_v13 = vsub.f32 %v932_v48, %v939_v11 }
 0x7a9   :  { %v914_v2 = vsub.f32 %v906_v55, %v913_v12 }
 0x7aa   :  { %v941_v14 = vmul.f32 0.5, %v940_v13 }
 0x7ab   :  { %v928_v15 = vadd.f32 %v927_v1, %v914_v2 }
 0x7ad   :  { %v942_v16 = vadd.f32 %v941_v14, %v928_v15 }
 0x7af   :  { %v950_v17 = vrot.slane %v942_v16, %v1650_v24 }
 0x7b1   :  { %v951_v18 = vcombine.high %v950_v17, %v950_v17  ;;  %1137 = vst.sshfl [vmem:[#allocation8] sm:$0x1 pattern:$0x73625140] %v950_v17 }
 0x7b3   :  { %1138 = vst.sshfl [vmem:[#allocation8 + $0x8] sm:$0x1 pattern:$0x73625140] %v951_v18 }
 0x7b4   :  { %1367 = shalt.err (!%p1364_p6)
}
 0x7b5   :  { %s1368_s23 = scalar_lea.hbm %s1766_s21, 256 }
 0x7b6   :  { %p1369_p7 = scmp.ne.s32.totalorder %s1766_s21, %s1368_s23  ;;  %p1372_p8 = scmp.lt.u32.totalorder %s1368_s23, %s1766_s21 }
 0x7b8   :  { %p1374_p9 = pnand %p1372_p8, %p1369_p7 }
 0x7ba   :  { %1377 = shalt.err (!%p1374_p9)
}
 0x7bb   :  { %s1391_s12 = smov 128   ;;  %s1392_s29 = smov 8  }
 0x7bc   :  { %1095 = dma.vmem_to_hbm [thread:$0]  %s1090_s0, 256, %s1766_s21, [#allocation5], %s1391_s12, %s1391_s12, %s1392_s29  }
 0x7bd   :  { %1382 = dma.done.wait [#allocation5], 256  }
 0x7be   :  { %1383 = vsyncadd [#allocation5], 4294967040 }
 0x7bf   :  { %1099 = vsyncpa [#allocation4], 1 }
 0x7c0   :  { %1100 = vsyncpa [#allocation7], 1 }
 0x7c1   :  { %1101 = vsyncpa [#allocation5], 1 }

</bundles_post_ra>
